<compile_context>
chip_gen: v7x
topology: tpu7x:2x2x1
jax: 0.10.0
libtpu: 0.0.40
codegen_flags: <defaults>
</compile_context>

<pallas_src>
import functools

import jax
import jax.numpy as jnp
from jax.experimental import pallas as pl
from jax.experimental.pallas import tpu as pltpu

_MASK_NEG = -1e30  # finite "minus infinity" for masked keys


def _cross_attn_kernel(mask_ref, q_ref, kv_ref,
                       wq_ref, bq_ref, wk_ref, bk_ref, wv_ref, bv_ref,
                       wo_ref, bo_ref, gamma_ref, beta_ref,
                       out_ref, *rest, num_heads, head_dim, with_attn):
    if with_attn:
        attn_ref, k_ref, v_ref, ctx_ref = rest
    else:
        attn_ref = None
        k_ref, v_ref, ctx_ref = rest

    bt, tq, D = q_ref.shape
    Lk = kv_ref.shape[1]
    compute_dtype = wq_ref.dtype            # bf16 or f32, chosen by the wrapper

    # --- K/V projections: once per batch tile (query-row axis is the inner,
    # --- sequential grid axis), cached in compute-dtype VMEM slabs. ---
    @pl.when(pl.program_id(1) == 0)
    def _():
        xkv = kv_ref[...].reshape(bt * Lk, D).astype(compute_dtype)
        K = jnp.dot(xkv, wk_ref[...], preferred_element_type=jnp.float32) + bk_ref[...]
        V = jnp.dot(xkv, wv_ref[...], preferred_element_type=jnp.float32) + bv_ref[...]
        k_ref[...] = K.astype(k_ref.dtype).reshape(bt, Lk, D)
        v_ref[...] = V.astype(v_ref.dtype).reshape(bt, Lk, D)

    # --- Q projection; 1/sqrt(head_dim)/clamp(temperature, 0.1) folded into wq/bq. ---
    x_in = q_ref[...].reshape(bt * tq, D)                    # residual source (cast lazily)
    Q = jnp.dot(x_in.astype(compute_dtype), wq_ref[...],
                preferred_element_type=jnp.float32) + bq_ref[...]
    Qs = Q.astype(compute_dtype).reshape(bt, tq, D)

    # additive key-mask bias, broadcast once (not once per head)
    bias = jnp.broadcast_to(mask_ref[...], (bt, tq, Lk))

    if with_attn:
        attn_ref[...] = jnp.zeros_like(attn_ref)             # accumulate in the output block

    for h in range(num_heads):                                # static head loop
        sl = slice(h * head_dim, (h + 1) * head_dim)
        s = jnp.einsum('bqd,bkd->bqk', Qs[:, :, sl], k_ref[:, :, sl],
                       preferred_element_type=jnp.float32) + bias
        m = jnp.max(s, axis=-1, keepdims=True)
        p = jnp.exp(s - m)
        denom = jnp.sum(p, axis=-1, keepdims=True)
        attn = p * pl.reciprocal(denom, approx=True)          # softmax via EUP reciprocal
        if with_attn:
            attn_ref[...] += attn.astype(attn_ref.dtype)
        ctx_ref[:, :, sl] = jnp.einsum(
            'bqk,bkd->bqd', attn.astype(compute_dtype), v_ref[:, :, sl],
            preferred_element_type=jnp.float32).astype(ctx_ref.dtype)

    if with_attn:
        attn_ref[...] = attn_ref[...] * (1.0 / num_heads)     # head average

    # --- output projection + residual + LayerNorm (eps = 1e-5, nn.LayerNorm default) ---
    context = ctx_ref[...].reshape(bt * tq, D)
    proj = jnp.dot(context, wo_ref[...], preferred_element_type=jnp.float32) + bo_ref[...]

    res = proj + x_in.astype(jnp.float32)
    mean = jnp.mean(res, axis=-1, keepdims=True)
    var = jnp.mean((res - mean) ** 2, axis=-1, keepdims=True)
    out = (res - mean) * jax.lax.rsqrt(var + 1e-5) * gamma_ref[...] + beta_ref[...]
    out_ref[...] = out.reshape(bt, tq, D).astype(out_ref.dtype)


def _vmem_capacity_bytes():
    """Per-core VMEM capacity; conservative (v7x) fallback if the query fails."""
    try:
        info = pltpu.get_tpu_info()
        cap = getattr(info, "vmem_capacity_bytes", None)
        if cap:
            return int(cap)
    except Exception:
        pass
    return 64 * 1024 * 1024


def _choose_tiles(B, L, D, in_bytes, out_bytes, attn_bytes, comp_bytes,
                  with_attn, vmem_budget, max_rows=2048):
    """Pick (bt, tq): batch tile and query-row tile.

    VMEM-aware: per-step footprint (double-buffered I/O blocks, single-buffered weights,
    K/V/ctx scratch slabs, an estimate of live temporaries) must fit the budget.
    Prefers >= 2 batch grid steps (megacore), then the largest rows-per-step, then an
    even batch step count."""
    def footprint(bt, tq):
        weights = 4 * D * D * comp_bytes + 8 * D * 4                 # single-buffered
        blocks = 2 * (bt * tq * D * in_bytes        # query block
                      + bt * L * D * in_bytes       # key_value block
                      + bt * L * 4                  # mask bias block
                      + bt * tq * D * out_bytes)    # output block
        if with_attn:
            blocks += 2 * bt * tq * L * attn_bytes
        scratch = (2 * bt * L * D + bt * tq * D) * comp_bytes         # K/V/ctx slabs
        live = (3 * bt * L * D + 4 * bt * tq * D) * 4 + 4 * bt * tq * L * 4
        return weights + blocks + scratch + live

    tq_opts = sorted({d for d in range(8, L + 1, 8) if L % d == 0} | {L})
    bt_opts = [d for d in range(1, B + 1) if B % d == 0]

    best = None
    for bt in bt_opts:
        for tq in tq_opts:
            if bt * tq > max_rows or footprint(bt, tq) > vmem_budget:
                continue
            nb = B // bt
            key = (nb >= 2, bt * tq, nb % 2 == 0, tq)
            if best is None or key > best[0]:
                best = (key, (bt, tq))
    if best is None:                       # nothing fits: smallest legal tile
        return 1, tq_opts[0]
    return best[1]


def cross_modal_attention(query, key_value, attention_mask, params, num_heads, *,
                          compute_dtype=jnp.float32, attn_dtype=None,
                          return_attn_weights=True):
    B, L, D = query.shape
    assert D % num_heads == 0
    head_dim = D // num_heads
    # pass attn_dtype=jnp.bfloat16 to halve the (B, L, L) writeback if you only visualize
    attn_dtype = attn_dtype or query.dtype

    if attention_mask is None:
        attention_mask = jnp.ones((B, L), dtype=bool)
    # additive key bias: 0 where valid, large finite negative where masked.
    mask_bias = jnp.where(attention_mask, 0.0, _MASK_NEG).astype(jnp.float32).reshape(B, 1, L)

    # Fold 1/sqrt(head_dim) / temperature.clamp(min=0.1) into the Q projection (one-time
    # D^2 scale in the wrapper; removes the in-kernel scale multiply + temperature operand).
    scale = (1.0 / (head_dim ** 0.5)) / jnp.maximum(params["temperature"].reshape(()), 0.1)

    # PyTorch Linear stores W as (out, in); pre-transpose so the kernel does x @ W.
    # Weights in compute_dtype (bf16 halves DMA + doubles MXU rate); biases/LN stay f32.
    wq = (params["wq"].T * scale).astype(compute_dtype)
    wk = params["wk"].T.astype(compute_dtype)
    wv = params["wv"].T.astype(compute_dtype)
    wo = params["wo"].T.astype(compute_dtype)
    bq = (params["bq"] * scale).reshape(1, D).astype(jnp.float32)
    bk = params["bk"].reshape(1, D).astype(jnp.float32)
    bv = params["bv"].reshape(1, D).astype(jnp.float32)
    bo = params["bo"].reshape(1, D).astype(jnp.float32)
    gamma = params["ln_gamma"].reshape(1, D).astype(jnp.float32)
    beta = params["ln_beta"].reshape(1, D).astype(jnp.float32)

    isz = lambda dt: jnp.dtype(dt).itemsize
    vmem_cap = _vmem_capacity_bytes()
    bt, tq = _choose_tiles(B, L, D, isz(query.dtype), isz(query.dtype),
                           isz(attn_dtype), isz(compute_dtype),
                           return_attn_weights, int(vmem_cap * 0.45))

    kernel = functools.partial(_cross_attn_kernel, num_heads=num_heads,
                               head_dim=head_dim, with_attn=return_attn_weights)

    # grid-invariant operands: single-buffer them (constant index_map => no re-DMA anyway)
    once = pl.Buffered(1)
    wspec = pl.BlockSpec((D, D), lambda b, q: (0, 0), pipeline_mode=once)
    vspec = pl.BlockSpec((1, D), lambda b, q: (0, 0), pipeline_mode=once)

    in_specs = [
        pl.BlockSpec((bt, 1, L), lambda b, q: (b, 0, 0)),     # additive mask bias
        pl.BlockSpec((bt, tq, D), lambda b, q: (b, q, 0)),    # query rows
        pl.BlockSpec((bt, L, D), lambda b, q: (b, 0, 0)),     # key/value rows (full L)
        wspec, vspec,                                         # wq, bq (scale folded in)
        wspec, vspec,                                         # wk, bk
        wspec, vspec,                                         # wv, bv
        wspec, vspec,                                         # wo, bo
        vspec, vspec,                                         # ln gamma, beta
    ]
    out_specs = [pl.BlockSpec((bt, tq, D), lambda b, q: (b, q, 0))]
    out_shapes = [jax.ShapeDtypeStruct((B, L, D), query.dtype)]
    if return_attn_weights:
        out_specs.append(pl.BlockSpec((bt, tq, L), lambda b, q: (b, q, 0)))
        out_shapes.append(jax.ShapeDtypeStruct((B, L, L), attn_dtype))

    grid_spec = pltpu.PrefetchScalarGridSpec(
        num_scalar_prefetch=0,
        grid=(B // bt, L // tq),                              # (parallel batch, inner q rows)
        in_specs=in_specs,
        out_specs=tuple(out_specs),
        scratch_shapes=[
            pltpu.VMEM((bt, L, D), compute_dtype),            # cached K (per batch tile)
            pltpu.VMEM((bt, L, D), compute_dtype),            # cached V (per batch tile)
            pltpu.VMEM((bt, tq, D), compute_dtype),           # per-head context slab
        ],
    )

    result = pl.pallas_call(
        kernel,
        out_shape=tuple(out_shapes),
        grid_spec=grid_spec,
        compiler_params=pltpu.CompilerParams(
            dimension_semantics=("parallel", "arbitrary"),
            vmem_limit_bytes=int(vmem_cap * 0.75),            # raise the scoped-VMEM default
        ),
    )(mask_bias, query, key_value, wq, bq, wk, bk, wv, bv, wo, bo, gamma, beta)

    if return_attn_weights:
        out, attn = result
        return out, attn
    (out,) = result
    return out


def _reference(query, key_value, attention_mask, params, num_heads):
    """Pure-JAX reference mirroring the PyTorch forward (eval mode)."""
    B, L, D = query.shape
    hd = D // num_heads
    Q = query @ params["wq"].T + params["bq"]
    K = key_value @ params["wk"].T + params["bk"]
    V = key_value @ params["wv"].T + params["bv"]
    Q = Q.reshape(B, L, num_heads, hd).transpose(0, 2, 1, 3)
    K = K.reshape(B, L, num_heads, hd).transpose(0, 2, 1, 3)
    V = V.reshape(B, L, num_heads, hd).transpose(0, 2, 1, 3)
    scores = jnp.einsum("bhqd,bhkd->bhqk", Q, K) / (hd ** 0.5)
    scores = scores / jnp.maximum(params["temperature"][0], 0.1)
    mask = attention_mask[:, None, None, :]
    scores = jnp.where(mask, scores, -jnp.inf)
    attn = jax.nn.softmax(scores, axis=-1)
    ctx = jnp.einsum("bhqk,bhkd->bhqd", attn, V)
    ctx = ctx.transpose(0, 2, 1, 3).reshape(B, L, D)
    out = ctx @ params["wo"].T + params["bo"]
    res = out + query
    mean = res.mean(-1, keepdims=True)
    var = ((res - mean) ** 2).mean(-1, keepdims=True)
    out = (res - mean) / jnp.sqrt(var + 1e-5) * params["ln_gamma"] + params["ln_beta"]
    return out, attn.mean(axis=1)


if __name__ == "__main__":
    B, L, D, H = 4, 8, 32, 4

    key = jax.random.PRNGKey(0)
    ks = jax.random.split(key, 12)

    params = {
        "wq": jax.random.normal(ks[0], (D, D), jnp.float32) * 0.05,
        "bq": jax.random.normal(ks[1], (D,), jnp.float32) * 0.01,
        "wk": jax.random.normal(ks[2], (D, D), jnp.float32) * 0.05,
        "bk": jax.random.normal(ks[3], (D,), jnp.float32) * 0.01,
        "wv": jax.random.normal(ks[4], (D, D), jnp.float32) * 0.05,
        "bv": jax.random.normal(ks[5], (D,), jnp.float32) * 0.01,
        "wo": jax.random.normal(ks[6], (D, D), jnp.float32) * 0.05,
        "bo": jax.random.normal(ks[7], (D,), jnp.float32) * 0.01,
        "ln_gamma": jnp.ones((D,), jnp.float32),
        "ln_beta": jnp.zeros((D,), jnp.float32),
        "temperature": jnp.ones((1,), jnp.float32),
    }

    query = jax.random.normal(ks[8], (B, L, D), jnp.float32)
    key_value = jax.random.normal(ks[9], (B, L, D), jnp.float32)
    # valid-position mask: varying number of valid keys per batch row
    valid_lens = jnp.array([6, 8, 3, 8])
    attention_mask = jnp.arange(L)[None, :] < valid_lens[:, None]   # (B, L) bool

    ref_out, ref_attn = _reference(query, key_value, attention_mask, params, H)

    # f32 matmul operands (reference semantics; only the approx softmax reciprocal differs)
    out, attn_avg = cross_modal_attention(query, key_value, attention_mask, params, H,
                                          compute_dtype=jnp.float32)
    jax.block_until_ready((out, attn_avg))
    assert out.shape == (B, L, D) and attn_avg.shape == (B, L, L)
    assert jnp.allclose(out, ref_out, rtol=5e-3, atol=5e-3), "output mismatch (f32)"
    assert jnp.allclose(attn_avg, ref_attn, rtol=5e-3, atol=5e-3), "attn mismatch (f32)"

    # bf16 matmul operands with f32 accumulation (v5e/v6e/v7x fast path)
    out_bf, attn_bf = cross_modal_attention(query, key_value, attention_mask, params, H,
                                            compute_dtype=jnp.bfloat16)
    jax.block_until_ready((out_bf, attn_bf))
    assert jnp.allclose(out_bf, ref_out, rtol=5e-2, atol=5e-2), "output mismatch (bf16)"
    assert jnp.allclose(attn_bf, ref_attn, rtol=5e-2, atol=5e-2), "attn mismatch (bf16)"

    # attention-weights output disabled: skips the (B, L, L) writeback entirely
    out_only = cross_modal_attention(query, key_value, attention_mask, params, H,
                                     compute_dtype=jnp.float32, return_attn_weights=False)
    jax.block_until_ready(out_only)
    assert jnp.allclose(out_only, ref_out, rtol=5e-3, atol=5e-3), "output mismatch (no-attn)"

    print("KERNEL_OK")
</pallas_src>

<mosaic_0001>
module attributes {stable_mosaic.version = 11 : i64} {
  func.func @_cross_attn_kernel(%arg0: i32, %arg1: i32, %arg2: memref<2x1x8xf32, #tpu.memory_space<vmem>>, %arg3: memref<2x8x32xf32, #tpu.memory_space<vmem>>, %arg4: memref<2x8x32xf32, #tpu.memory_space<vmem>>, %arg5: memref<32x32xf32, #tpu.memory_space<vmem>>, %arg6: memref<1x32xf32, #tpu.memory_space<vmem>>, %arg7: memref<32x32xf32, #tpu.memory_space<vmem>>, %arg8: memref<1x32xf32, #tpu.memory_space<vmem>>, %arg9: memref<32x32xf32, #tpu.memory_space<vmem>>, %arg10: memref<1x32xf32, #tpu.memory_space<vmem>>, %arg11: memref<32x32xf32, #tpu.memory_space<vmem>>, %arg12: memref<1x32xf32, #tpu.memory_space<vmem>>, %arg13: memref<1x32xf32, #tpu.memory_space<vmem>>, %arg14: memref<1x32xf32, #tpu.memory_space<vmem>>, %arg15: memref<2x8x32xf32, #tpu.memory_space<vmem>>, %arg16: memref<2x8x8xf32, #tpu.memory_space<vmem>>, %arg17: memref<2x8x32xf32, #tpu.memory_space<vmem>>, %arg18: memref<2x8x32xf32, #tpu.memory_space<vmem>>, %arg19: memref<2x8x32xf32, #tpu.memory_space<vmem>>) attributes {dimension_semantics = [#tpu.dimension_semantics<parallel>, #tpu.dimension_semantics<arbitrary>], iteration_bounds = array<i64: 2, 1>, scalar_prefetch = 0 : i64, scratch_operands = 3 : i64, tpu.core_type = #tpu.core_type<tc>, window_params = [{transform_indices = @transform_0, window_bounds = array<i64: 2, 1, 8>}, {transform_indices = @transform_1, window_bounds = array<i64: 2, 8, 32>}, {transform_indices = @transform_2, window_bounds = array<i64: 2, 8, 32>}, {pipeline_mode = #tpu.pipeline_mode<synchronous>, transform_indices = @transform_3, window_bounds = array<i64: 32, 32>}, {pipeline_mode = #tpu.pipeline_mode<synchronous>, transform_indices = @transform_4, window_bounds = array<i64: 1, 32>}, {pipeline_mode = #tpu.pipeline_mode<synchronous>, transform_indices = @transform_5, window_bounds = array<i64: 32, 32>}, {pipeline_mode = #tpu.pipeline_mode<synchronous>, transform_indices = @transform_6, window_bounds = array<i64: 1, 32>}, {pipeline_mode = #tpu.pipeline_mode<synchronous>, transform_indices = @transform_7, window_bounds = array<i64: 32, 32>}, {pipeline_mode = #tpu.pipeline_mode<synchronous>, transform_indices = @transform_8, window_bounds = array<i64: 1, 32>}, {pipeline_mode = #tpu.pipeline_mode<synchronous>, transform_indices = @transform_9, window_bounds = array<i64: 32, 32>}, {pipeline_mode = #tpu.pipeline_mode<synchronous>, transform_indices = @transform_10, window_bounds = array<i64: 1, 32>}, {pipeline_mode = #tpu.pipeline_mode<synchronous>, transform_indices = @transform_11, window_bounds = array<i64: 1, 32>}, {pipeline_mode = #tpu.pipeline_mode<synchronous>, transform_indices = @transform_12, window_bounds = array<i64: 1, 32>}, {transform_indices = @transform_13, window_bounds = array<i64: 2, 8, 32>}, {transform_indices = @transform_14, window_bounds = array<i64: 2, 8, 8>}]} {
    %c0_i32 = arith.constant 0 : i32
    %0 = arith.cmpi eq, %arg1, %c0_i32 : i32
    %1 = arith.extui %0 : i1 to i32
    %c0_i32_0 = arith.constant 0 : i32
    %2 = arith.cmpi ne, %1, %c0_i32_0 : i32
    scf.if %2 {
      %c0_114 = arith.constant 0 : index
      %c0_115 = arith.constant 0 : index
      %c0_116 = arith.constant 0 : index
      %134 = vector.load %arg4[%c0_114, %c0_115, %c0_116] : memref<2x8x32xf32, #tpu.memory_space<vmem>>, vector<2x8x32xf32>
      %135 = vector.shape_cast %134 : vector<2x8x32xf32> to vector<16x32xf32>
      %c0_117 = arith.constant 0 : index
      %c0_118 = arith.constant 0 : index
      %136 = vector.load %arg7[%c0_117, %c0_118] : memref<32x32xf32, #tpu.memory_space<vmem>>, vector<32x32xf32>
      %cst_119 = arith.constant dense<0.000000e+00> : vector<16x32xf32>
      %137 = tpu.matmul %135, %136, %cst_119 {dimension_numbers = #tpu.dot_dimension_numbers<[1], [0], [0], [1], [0, 0, 1, 1], [], []>} : vector<16x32xf32>, vector<32x32xf32>, vector<16x32xf32> -> vector<16x32xf32>
      %c0_120 = arith.constant 0 : index
      %c0_121 = arith.constant 0 : index
      %138 = vector.load %arg8[%c0_120, %c0_121] : memref<1x32xf32, #tpu.memory_space<vmem>>, vector<1x32xf32>
      %139 = vector.broadcast %138 : vector<1x32xf32> to vector<16x32xf32>
      %140 = arith.addf %137, %139 : vector<16x32xf32>
      %c0_122 = arith.constant 0 : index
      %c0_123 = arith.constant 0 : index
      %141 = vector.load %arg9[%c0_122, %c0_123] : memref<32x32xf32, #tpu.memory_space<vmem>>, vector<32x32xf32>
      %cst_124 = arith.constant dense<0.000000e+00> : vector<16x32xf32>
      %142 = tpu.matmul %135, %141, %cst_124 {dimension_numbers = #tpu.dot_dimension_numbers<[1], [0], [0], [1], [0, 0, 1, 1], [], []>} : vector<16x32xf32>, vector<32x32xf32>, vector<16x32xf32> -> vector<16x32xf32>
      %c0_125 = arith.constant 0 : index
      %c0_126 = arith.constant 0 : index
      %143 = vector.load %arg10[%c0_125, %c0_126] : memref<1x32xf32, #tpu.memory_space<vmem>>, vector<1x32xf32>
      %144 = vector.broadcast %143 : vector<1x32xf32> to vector<16x32xf32>
      %145 = arith.addf %142, %144 : vector<16x32xf32>
      %146 = vector.shape_cast %140 : vector<16x32xf32> to vector<2x8x32xf32>
      %c0_127 = arith.constant 0 : index
      %c0_128 = arith.constant 0 : index
      %c0_129 = arith.constant 0 : index
      %147 = vector.load %arg17[%c0_127, %c0_128, %c0_129] : memref<2x8x32xf32, #tpu.memory_space<vmem>>, vector<2x8x32xf32>
      tpu.vector_store %arg17[%c0_127, %c0_128, %c0_129], %146 {strides = array<i32>} : memref<2x8x32xf32, #tpu.memory_space<vmem>>, vector<2x8x32xf32>,
      %148 = vector.shape_cast %145 : vector<16x32xf32> to vector<2x8x32xf32>
      %c0_130 = arith.constant 0 : index
      %c0_131 = arith.constant 0 : index
      %c0_132 = arith.constant 0 : index
      %149 = vector.load %arg18[%c0_130, %c0_131, %c0_132] : memref<2x8x32xf32, #tpu.memory_space<vmem>>, vector<2x8x32xf32>
      tpu.vector_store %arg18[%c0_130, %c0_131, %c0_132], %148 {strides = array<i32>} : memref<2x8x32xf32, #tpu.memory_space<vmem>>, vector<2x8x32xf32>,
    } else {
    }
    %c0 = arith.constant 0 : index
    %c0_1 = arith.constant 0 : index
    %c0_2 = arith.constant 0 : index
    %3 = vector.load %arg3[%c0, %c0_1, %c0_2] : memref<2x8x32xf32, #tpu.memory_space<vmem>>, vector<2x8x32xf32>
    %4 = vector.shape_cast %3 : vector<2x8x32xf32> to vector<16x32xf32>
    %c0_3 = arith.constant 0 : index
    %c0_4 = arith.constant 0 : index
    %5 = vector.load %arg5[%c0_3, %c0_4] : memref<32x32xf32, #tpu.memory_space<vmem>>, vector<32x32xf32>
    %cst = arith.constant dense<0.000000e+00> : vector<16x32xf32>
    %6 = tpu.matmul %4, %5, %cst {dimension_numbers = #tpu.dot_dimension_numbers<[1], [0], [0], [1], [0, 0, 1, 1], [], []>} : vector<16x32xf32>, vector<32x32xf32>, vector<16x32xf32> -> vector<16x32xf32>
    %c0_5 = arith.constant 0 : index
    %c0_6 = arith.constant 0 : index
    %7 = vector.load %arg6[%c0_5, %c0_6] : memref<1x32xf32, #tpu.memory_space<vmem>>, vector<1x32xf32>
    %8 = vector.broadcast %7 : vector<1x32xf32> to vector<16x32xf32>
    %9 = arith.addf %6, %8 : vector<16x32xf32>
    %10 = vector.shape_cast %9 : vector<16x32xf32> to vector<2x8x32xf32>
    %c0_7 = arith.constant 0 : index
    %c0_8 = arith.constant 0 : index
    %c0_9 = arith.constant 0 : index
    %11 = vector.load %arg2[%c0_7, %c0_8, %c0_9] : memref<2x1x8xf32, #tpu.memory_space<vmem>>, vector<2x1x8xf32>
    %12 = vector.shape_cast %11 : vector<2x1x8xf32> to vector<2x1x8xf32>
    %13 = vector.broadcast %12 : vector<2x1x8xf32> to vector<2x8x8xf32>
    %cst_10 = arith.constant 0.000000e+00 : f32
    %14 = vector.broadcast %cst_10 : f32 to vector<2x8x8xf32>
    %c0_11 = arith.constant 0 : index
    %c0_12 = arith.constant 0 : index
    %c0_13 = arith.constant 0 : index
    %15 = vector.load %arg16[%c0_11, %c0_12, %c0_13] : memref<2x8x8xf32, #tpu.memory_space<vmem>>, vector<2x8x8xf32>
    tpu.vector_store %arg16[%c0_11, %c0_12, %c0_13], %14 {strides = array<i32>} : memref<2x8x8xf32, #tpu.memory_space<vmem>>, vector<2x8x8xf32>,
    %16 = vector.extract_strided_slice %10 {offsets = [0, 0, 0], sizes = [2, 8, 8], strides = [1, 1, 1]} : vector<2x8x32xf32> to vector<2x8x8xf32>
    %c0_14 = arith.constant 0 : index
    %c0_15 = arith.constant 0 : index
    %c0_16 = arith.constant 0 : index
    %17 = vector.load %arg17[%c0_14, %c0_15, %c0_16] : memref<2x8x32xf32, #tpu.memory_space<vmem>>, vector<2x8x8xf32>
    "tpu.trace_start"() <{level = 10 : i32, message = "bqd,bkd->bqk"}> : () -> ()
    %cst_17 = arith.constant dense<0.000000e+00> : vector<2x8x8xf32>
    %18 = tpu.matmul %16, %17, %cst_17 {dimension_numbers = #tpu.dot_dimension_numbers<[2], [2], [1], [1], [0, 0, 0, 1, 1, 1], [0], [0]>} : vector<2x8x8xf32>, vector<2x8x8xf32>, vector<2x8x8xf32> -> vector<2x8x8xf32>
    "tpu.trace_stop"() : () -> ()
    %19 = arith.addf %18, %13 : vector<2x8x8xf32>
    %cst_18 = arith.constant dense<0xFF800000> : vector<2x8xf32>
    %20 = vector.multi_reduction <maximumf>, %19, %cst_18 [2] : vector<2x8x8xf32> to vector<2x8xf32>
    %21 = vector.shape_cast %20 : vector<2x8xf32> to vector<2x8x1xf32>
    %22 = vector.broadcast %21 : vector<2x8x1xf32> to vector<2x8x8xf32>
    %23 = arith.subf %19, %22 : vector<2x8x8xf32>
    %24 = math.exp %23 : vector<2x8x8xf32>
    %cst_19 = arith.constant dense<0.000000e+00> : vector<2x8xf32>
    %25 = vector.multi_reduction <add>, %24, %cst_19 [2] : vector<2x8x8xf32> to vector<2x8xf32>
    %26 = vector.shape_cast %25 : vector<2x8xf32> to vector<2x8x1xf32>
    %27 = tpu.reciprocal %26 {approx = true} : vector<2x8x1xf32> -> vector<2x8x1xf32>
    %28 = vector.broadcast %27 : vector<2x8x1xf32> to vector<2x8x8xf32>
    %29 = arith.mulf %24, %28 : vector<2x8x8xf32>
    %c0_20 = arith.constant 0 : index
    %c0_21 = arith.constant 0 : index
    %c0_22 = arith.constant 0 : index
    %30 = vector.load %arg16[%c0_20, %c0_21, %c0_22] : memref<2x8x8xf32, #tpu.memory_space<vmem>>, vector<2x8x8xf32>
    %31 = arith.addf %30, %29 : vector<2x8x8xf32>
    %c0_23 = arith.constant 0 : index
    %c0_24 = arith.constant 0 : index
    %c0_25 = arith.constant 0 : index
    %32 = vector.load %arg16[%c0_23, %c0_24, %c0_25] : memref<2x8x8xf32, #tpu.memory_space<vmem>>, vector<2x8x8xf32>
    tpu.vector_store %arg16[%c0_23, %c0_24, %c0_25], %31 {strides = array<i32>} : memref<2x8x8xf32, #tpu.memory_space<vmem>>, vector<2x8x8xf32>,
    %c0_26 = arith.constant 0 : index
    %c0_27 = arith.constant 0 : index
    %c0_28 = arith.constant 0 : index
    %33 = vector.load %arg18[%c0_26, %c0_27, %c0_28] : memref<2x8x32xf32, #tpu.memory_space<vmem>>, vector<2x8x8xf32>
    "tpu.trace_start"() <{level = 10 : i32, message = "bqk,bkd->bqd"}> : () -> ()
    %cst_29 = arith.constant dense<0.000000e+00> : vector<2x8x8xf32>
    %34 = tpu.matmul %29, %33, %cst_29 {dimension_numbers = #tpu.dot_dimension_numbers<[2], [1], [1], [2], [0, 0, 0, 1, 1, 2], [0], [0]>} : vector<2x8x8xf32>, vector<2x8x8xf32>, vector<2x8x8xf32> -> vector<2x8x8xf32>
    "tpu.trace_stop"() : () -> ()
    %c0_30 = arith.constant 0 : index
    %c0_31 = arith.constant 0 : index
    %c0_32 = arith.constant 0 : index
    %35 = vector.load %arg19[%c0_30, %c0_31, %c0_32] : memref<2x8x32xf32, #tpu.memory_space<vmem>>, vector<2x8x8xf32>
    tpu.vector_store %arg19[%c0_30, %c0_31, %c0_32], %34 {strides = array<i32>} : memref<2x8x32xf32, #tpu.memory_space<vmem>>, vector<2x8x8xf32>,
    %36 = vector.extract_strided_slice %10 {offsets = [0, 0, 8], sizes = [2, 8, 8], strides = [1, 1, 1]} : vector<2x8x32xf32> to vector<2x8x8xf32>
    %c0_33 = arith.constant 0 : index
    %c0_34 = arith.constant 0 : index
    %c8 = arith.constant 8 : index
    %37 = vector.load %arg17[%c0_33, %c0_34, %c8] : memref<2x8x32xf32, #tpu.memory_space<vmem>>, vector<2x8x8xf32>
    "tpu.trace_start"() <{level = 10 : i32, message = "bqd,bkd->bqk"}> : () -> ()
    %cst_35 = arith.constant dense<0.000000e+00> : vector<2x8x8xf32>
    %38 = tpu.matmul %36, %37, %cst_35 {dimension_numbers = #tpu.dot_dimension_numbers<[2], [2], [1], [1], [0, 0, 0, 1, 1, 1], [0], [0]>} : vector<2x8x8xf32>, vector<2x8x8xf32>, vector<2x8x8xf32> -> vector<2x8x8xf32>
    "tpu.trace_stop"() : () -> ()
    %39 = arith.addf %38, %13 : vector<2x8x8xf32>
    %cst_36 = arith.constant dense<0xFF800000> : vector<2x8xf32>
    %40 = vector.multi_reduction <maximumf>, %39, %cst_36 [2] : vector<2x8x8xf32> to vector<2x8xf32>
    %41 = vector.shape_cast %40 : vector<2x8xf32> to vector<2x8x1xf32>
    %42 = vector.broadcast %41 : vector<2x8x1xf32> to vector<2x8x8xf32>
    %43 = arith.subf %39, %42 : vector<2x8x8xf32>
    %44 = math.exp %43 : vector<2x8x8xf32>
    %cst_37 = arith.constant dense<0.000000e+00> : vector<2x8xf32>
    %45 = vector.multi_reduction <add>, %44, %cst_37 [2] : vector<2x8x8xf32> to vector<2x8xf32>
    %46 = vector.shape_cast %45 : vector<2x8xf32> to vector<2x8x1xf32>
    %47 = tpu.reciprocal %46 {approx = true} : vector<2x8x1xf32> -> vector<2x8x1xf32>
    %48 = vector.broadcast %47 : vector<2x8x1xf32> to vector<2x8x8xf32>
    %49 = arith.mulf %44, %48 : vector<2x8x8xf32>
    %c0_38 = arith.constant 0 : index
    %c0_39 = arith.constant 0 : index
    %c0_40 = arith.constant 0 : index
    %50 = vector.load %arg16[%c0_38, %c0_39, %c0_40] : memref<2x8x8xf32, #tpu.memory_space<vmem>>, vector<2x8x8xf32>
    %51 = arith.addf %50, %49 : vector<2x8x8xf32>
    %c0_41 = arith.constant 0 : index
    %c0_42 = arith.constant 0 : index
    %c0_43 = arith.constant 0 : index
    %52 = vector.load %arg16[%c0_41, %c0_42, %c0_43] : memref<2x8x8xf32, #tpu.memory_space<vmem>>, vector<2x8x8xf32>
    tpu.vector_store %arg16[%c0_41, %c0_42, %c0_43], %51 {strides = array<i32>} : memref<2x8x8xf32, #tpu.memory_space<vmem>>, vector<2x8x8xf32>,
    %c0_44 = arith.constant 0 : index
    %c0_45 = arith.constant 0 : index
    %c8_46 = arith.constant 8 : index
    %53 = vector.load %arg18[%c0_44, %c0_45, %c8_46] : memref<2x8x32xf32, #tpu.memory_space<vmem>>, vector<2x8x8xf32>
    "tpu.trace_start"() <{level = 10 : i32, message = "bqk,bkd->bqd"}> : () -> ()
    %cst_47 = arith.constant dense<0.000000e+00> : vector<2x8x8xf32>
    %54 = tpu.matmul %49, %53, %cst_47 {dimension_numbers = #tpu.dot_dimension_numbers<[2], [1], [1], [2], [0, 0, 0, 1, 1, 2], [0], [0]>} : vector<2x8x8xf32>, vector<2x8x8xf32>, vector<2x8x8xf32> -> vector<2x8x8xf32>
    "tpu.trace_stop"() : () -> ()
    %c0_48 = arith.constant 0 : index
    %c0_49 = arith.constant 0 : index
    %c8_50 = arith.constant 8 : index
    %55 = vector.load %arg19[%c0_48, %c0_49, %c8_50] : memref<2x8x32xf32, #tpu.memory_space<vmem>>, vector<2x8x8xf32>
    tpu.vector_store %arg19[%c0_48, %c0_49, %c8_50], %54 {strides = array<i32>} : memref<2x8x32xf32, #tpu.memory_space<vmem>>, vector<2x8x8xf32>,
    %56 = vector.extract_strided_slice %10 {offsets = [0, 0, 16], sizes = [2, 8, 8], strides = [1, 1, 1]} : vector<2x8x32xf32> to vector<2x8x8xf32>
    %c0_51 = arith.constant 0 : index
    %c0_52 = arith.constant 0 : index
    %c16 = arith.constant 16 : index
    %57 = vector.load %arg17[%c0_51, %c0_52, %c16] : memref<2x8x32xf32, #tpu.memory_space<vmem>>, vector<2x8x8xf32>
    "tpu.trace_start"() <{level = 10 : i32, message = "bqd,bkd->bqk"}> : () -> ()
    %cst_53 = arith.constant dense<0.000000e+00> : vector<2x8x8xf32>
    %58 = tpu.matmul %56, %57, %cst_53 {dimension_numbers = #tpu.dot_dimension_numbers<[2], [2], [1], [1], [0, 0, 0, 1, 1, 1], [0], [0]>} : vector<2x8x8xf32>, vector<2x8x8xf32>, vector<2x8x8xf32> -> vector<2x8x8xf32>
    "tpu.trace_stop"() : () -> ()
    %59 = arith.addf %58, %13 : vector<2x8x8xf32>
    %cst_54 = arith.constant dense<0xFF800000> : vector<2x8xf32>
    %60 = vector.multi_reduction <maximumf>, %59, %cst_54 [2] : vector<2x8x8xf32> to vector<2x8xf32>
    %61 = vector.shape_cast %60 : vector<2x8xf32> to vector<2x8x1xf32>
    %62 = vector.broadcast %61 : vector<2x8x1xf32> to vector<2x8x8xf32>
    %63 = arith.subf %59, %62 : vector<2x8x8xf32>
    %64 = math.exp %63 : vector<2x8x8xf32>
    %cst_55 = arith.constant dense<0.000000e+00> : vector<2x8xf32>
    %65 = vector.multi_reduction <add>, %64, %cst_55 [2] : vector<2x8x8xf32> to vector<2x8xf32>
    %66 = vector.shape_cast %65 : vector<2x8xf32> to vector<2x8x1xf32>
    %67 = tpu.reciprocal %66 {approx = true} : vector<2x8x1xf32> -> vector<2x8x1xf32>
    %68 = vector.broadcast %67 : vector<2x8x1xf32> to vector<2x8x8xf32>
    %69 = arith.mulf %64, %68 : vector<2x8x8xf32>
    %c0_56 = arith.constant 0 : index
    %c0_57 = arith.constant 0 : index
    %c0_58 = arith.constant 0 : index
    %70 = vector.load %arg16[%c0_56, %c0_57, %c0_58] : memref<2x8x8xf32, #tpu.memory_space<vmem>>, vector<2x8x8xf32>
    %71 = arith.addf %70, %69 : vector<2x8x8xf32>
    %c0_59 = arith.constant 0 : index
    %c0_60 = arith.constant 0 : index
    %c0_61 = arith.constant 0 : index
    %72 = vector.load %arg16[%c0_59, %c0_60, %c0_61] : memref<2x8x8xf32, #tpu.memory_space<vmem>>, vector<2x8x8xf32>
    tpu.vector_store %arg16[%c0_59, %c0_60, %c0_61], %71 {strides = array<i32>} : memref<2x8x8xf32, #tpu.memory_space<vmem>>, vector<2x8x8xf32>,
    %c0_62 = arith.constant 0 : index
    %c0_63 = arith.constant 0 : index
    %c16_64 = arith.constant 16 : index
    %73 = vector.load %arg18[%c0_62, %c0_63, %c16_64] : memref<2x8x32xf32, #tpu.memory_space<vmem>>, vector<2x8x8xf32>
    "tpu.trace_start"() <{level = 10 : i32, message = "bqk,bkd->bqd"}> : () -> ()
    %cst_65 = arith.constant dense<0.000000e+00> : vector<2x8x8xf32>
    %74 = tpu.matmul %69, %73, %cst_65 {dimension_numbers = #tpu.dot_dimension_numbers<[2], [1], [1], [2], [0, 0, 0, 1, 1, 2], [0], [0]>} : vector<2x8x8xf32>, vector<2x8x8xf32>, vector<2x8x8xf32> -> vector<2x8x8xf32>
    "tpu.trace_stop"() : () -> ()
    %c0_66 = arith.constant 0 : index
    %c0_67 = arith.constant 0 : index
    %c16_68 = arith.constant 16 : index
    %75 = vector.load %arg19[%c0_66, %c0_67, %c16_68] : memref<2x8x32xf32, #tpu.memory_space<vmem>>, vector<2x8x8xf32>
    tpu.vector_store %arg19[%c0_66, %c0_67, %c16_68], %74 {strides = array<i32>} : memref<2x8x32xf32, #tpu.memory_space<vmem>>, vector<2x8x8xf32>,
    %76 = vector.extract_strided_slice %10 {offsets = [0, 0, 24], sizes = [2, 8, 8], strides = [1, 1, 1]} : vector<2x8x32xf32> to vector<2x8x8xf32>
    %c0_69 = arith.constant 0 : index
    %c0_70 = arith.constant 0 : index
    %c24 = arith.constant 24 : index
    %77 = vector.load %arg17[%c0_69, %c0_70, %c24] : memref<2x8x32xf32, #tpu.memory_space<vmem>>, vector<2x8x8xf32>
    "tpu.trace_start"() <{level = 10 : i32, message = "bqd,bkd->bqk"}> : () -> ()
    %cst_71 = arith.constant dense<0.000000e+00> : vector<2x8x8xf32>
    %78 = tpu.matmul %76, %77, %cst_71 {dimension_numbers = #tpu.dot_dimension_numbers<[2], [2], [1], [1], [0, 0, 0, 1, 1, 1], [0], [0]>} : vector<2x8x8xf32>, vector<2x8x8xf32>, vector<2x8x8xf32> -> vector<2x8x8xf32>
    "tpu.trace_stop"() : () -> ()
    %79 = arith.addf %78, %13 : vector<2x8x8xf32>
    %cst_72 = arith.constant dense<0xFF800000> : vector<2x8xf32>
    %80 = vector.multi_reduction <maximumf>, %79, %cst_72 [2] : vector<2x8x8xf32> to vector<2x8xf32>
    %81 = vector.shape_cast %80 : vector<2x8xf32> to vector<2x8x1xf32>
    %82 = vector.broadcast %81 : vector<2x8x1xf32> to vector<2x8x8xf32>
    %83 = arith.subf %79, %82 : vector<2x8x8xf32>
    %84 = math.exp %83 : vector<2x8x8xf32>
    %cst_73 = arith.constant dense<0.000000e+00> : vector<2x8xf32>
    %85 = vector.multi_reduction <add>, %84, %cst_73 [2] : vector<2x8x8xf32> to vector<2x8xf32>
    %86 = vector.shape_cast %85 : vector<2x8xf32> to vector<2x8x1xf32>
    %87 = tpu.reciprocal %86 {approx = true} : vector<2x8x1xf32> -> vector<2x8x1xf32>
    %88 = vector.broadcast %87 : vector<2x8x1xf32> to vector<2x8x8xf32>
    %89 = arith.mulf %84, %88 : vector<2x8x8xf32>
    %c0_74 = arith.constant 0 : index
    %c0_75 = arith.constant 0 : index
    %c0_76 = arith.constant 0 : index
    %90 = vector.load %arg16[%c0_74, %c0_75, %c0_76] : memref<2x8x8xf32, #tpu.memory_space<vmem>>, vector<2x8x8xf32>
    %91 = arith.addf %90, %89 : vector<2x8x8xf32>
    %c0_77 = arith.constant 0 : index
    %c0_78 = arith.constant 0 : index
    %c0_79 = arith.constant 0 : index
    %92 = vector.load %arg16[%c0_77, %c0_78, %c0_79] : memref<2x8x8xf32, #tpu.memory_space<vmem>>, vector<2x8x8xf32>
    tpu.vector_store %arg16[%c0_77, %c0_78, %c0_79], %91 {strides = array<i32>} : memref<2x8x8xf32, #tpu.memory_space<vmem>>, vector<2x8x8xf32>,
    %c0_80 = arith.constant 0 : index
    %c0_81 = arith.constant 0 : index
    %c24_82 = arith.constant 24 : index
    %93 = vector.load %arg18[%c0_80, %c0_81, %c24_82] : memref<2x8x32xf32, #tpu.memory_space<vmem>>, vector<2x8x8xf32>
    "tpu.trace_start"() <{level = 10 : i32, message = "bqk,bkd->bqd"}> : () -> ()
    %cst_83 = arith.constant dense<0.000000e+00> : vector<2x8x8xf32>
    %94 = tpu.matmul %89, %93, %cst_83 {dimension_numbers = #tpu.dot_dimension_numbers<[2], [1], [1], [2], [0, 0, 0, 1, 1, 2], [0], [0]>} : vector<2x8x8xf32>, vector<2x8x8xf32>, vector<2x8x8xf32> -> vector<2x8x8xf32>
    "tpu.trace_stop"() : () -> ()
    %c0_84 = arith.constant 0 : index
    %c0_85 = arith.constant 0 : index
    %c24_86 = arith.constant 24 : index
    %95 = vector.load %arg19[%c0_84, %c0_85, %c24_86] : memref<2x8x32xf32, #tpu.memory_space<vmem>>, vector<2x8x8xf32>
    tpu.vector_store %arg19[%c0_84, %c0_85, %c24_86], %94 {strides = array<i32>} : memref<2x8x32xf32, #tpu.memory_space<vmem>>, vector<2x8x8xf32>,
    %c0_87 = arith.constant 0 : index
    %c0_88 = arith.constant 0 : index
    %c0_89 = arith.constant 0 : index
    %96 = vector.load %arg16[%c0_87, %c0_88, %c0_89] : memref<2x8x8xf32, #tpu.memory_space<vmem>>, vector<2x8x8xf32>
    %cst_90 = arith.constant 2.500000e-01 : f32
    %97 = vector.broadcast %cst_90 : f32 to vector<2x8x8xf32>
    %98 = arith.mulf %96, %97 : vector<2x8x8xf32>
    %c0_91 = arith.constant 0 : index
    %c0_92 = arith.constant 0 : index
    %c0_93 = arith.constant 0 : index
    %99 = vector.load %arg16[%c0_91, %c0_92, %c0_93] : memref<2x8x8xf32, #tpu.memory_space<vmem>>, vector<2x8x8xf32>
    tpu.vector_store %arg16[%c0_91, %c0_92, %c0_93], %98 {strides = array<i32>} : memref<2x8x8xf32, #tpu.memory_space<vmem>>, vector<2x8x8xf32>,
    %c0_94 = arith.constant 0 : index
    %c0_95 = arith.constant 0 : index
    %c0_96 = arith.constant 0 : index
    %100 = vector.load %arg19[%c0_94, %c0_95, %c0_96] : memref<2x8x32xf32, #tpu.memory_space<vmem>>, vector<2x8x32xf32>
    %101 = vector.shape_cast %100 : vector<2x8x32xf32> to vector<16x32xf32>
    %c0_97 = arith.constant 0 : index
    %c0_98 = arith.constant 0 : index
    %102 = vector.load %arg11[%c0_97, %c0_98] : memref<32x32xf32, #tpu.memory_space<vmem>>, vector<32x32xf32>
    %cst_99 = arith.constant dense<0.000000e+00> : vector<16x32xf32>
    %103 = tpu.matmul %101, %102, %cst_99 {dimension_numbers = #tpu.dot_dimension_numbers<[1], [0], [0], [1], [0, 0, 1, 1], [], []>} : vector<16x32xf32>, vector<32x32xf32>, vector<16x32xf32> -> vector<16x32xf32>
    %c0_100 = arith.constant 0 : index
    %c0_101 = arith.constant 0 : index
    %104 = vector.load %arg12[%c0_100, %c0_101] : memref<1x32xf32, #tpu.memory_space<vmem>>, vector<1x32xf32>
    %105 = vector.broadcast %104 : vector<1x32xf32> to vector<16x32xf32>
    %106 = arith.addf %103, %105 : vector<16x32xf32>
    %107 = arith.addf %106, %4 : vector<16x32xf32>
    %cst_102 = arith.constant dense<0.000000e+00> : vector<16xf32>
    %108 = vector.multi_reduction <add>, %107, %cst_102 [1] : vector<16x32xf32> to vector<16xf32>
    %109 = vector.shape_cast %108 : vector<16xf32> to vector<16x1xf32>
    %cst_103 = arith.constant 3.200000e+01 : f32
    %110 = vector.broadcast %cst_103 : f32 to vector<16x1xf32>
    %111 = arith.divf %109, %110 : vector<16x1xf32>
    %112 = vector.broadcast %111 : vector<16x1xf32> to vector<16x32xf32>
    %113 = arith.subf %107, %112 : vector<16x32xf32>
    %114 = arith.mulf %113, %113 : vector<16x32xf32>
    %cst_104 = arith.constant dense<0.000000e+00> : vector<16xf32>
    %115 = vector.multi_reduction <add>, %114, %cst_104 [1] : vector<16x32xf32> to vector<16xf32>
    %116 = vector.shape_cast %115 : vector<16xf32> to vector<16x1xf32>
    %cst_105 = arith.constant 3.200000e+01 : f32
    %117 = vector.broadcast %cst_105 : f32 to vector<16x1xf32>
    %118 = arith.divf %116, %117 : vector<16x1xf32>
    %119 = vector.broadcast %111 : vector<16x1xf32> to vector<16x32xf32>
    %120 = arith.subf %107, %119 : vector<16x32xf32>
    %cst_106 = arith.constant 9.99999974E-6 : f32
    %121 = vector.broadcast %cst_106 : f32 to vector<16x1xf32>
    %122 = arith.addf %118, %121 : vector<16x1xf32>
    %123 = math.rsqrt %122 : vector<16x1xf32>
    %124 = vector.broadcast %123 : vector<16x1xf32> to vector<16x32xf32>
    %125 = arith.mulf %120, %124 : vector<16x32xf32>
    %c0_107 = arith.constant 0 : index
    %c0_108 = arith.constant 0 : index
    %126 = vector.load %arg13[%c0_107, %c0_108] : memref<1x32xf32, #tpu.memory_space<vmem>>, vector<1x32xf32>
    %127 = vector.broadcast %126 : vector<1x32xf32> to vector<16x32xf32>
    %128 = arith.mulf %125, %127 : vector<16x32xf32>
    %c0_109 = arith.constant 0 : index
    %c0_110 = arith.constant 0 : index
    %129 = vector.load %arg14[%c0_109, %c0_110] : memref<1x32xf32, #tpu.memory_space<vmem>>, vector<1x32xf32>
    %130 = vector.broadcast %129 : vector<1x32xf32> to vector<16x32xf32>
    %131 = arith.addf %128, %130 : vector<16x32xf32>
    %132 = vector.shape_cast %131 : vector<16x32xf32> to vector<2x8x32xf32>
    %c0_111 = arith.constant 0 : index
    %c0_112 = arith.constant 0 : index
    %c0_113 = arith.constant 0 : index
    %133 = vector.load %arg15[%c0_111, %c0_112, %c0_113] : memref<2x8x32xf32, #tpu.memory_space<vmem>>, vector<2x8x32xf32>
    tpu.vector_store %arg15[%c0_111, %c0_112, %c0_113], %132 {strides = array<i32>} : memref<2x8x32xf32, #tpu.memory_space<vmem>>, vector<2x8x32xf32>,
    return
  }
  func.func @transform_0(%arg0: i32, %arg1: i32) -> (i32, i32, i32) {
    %c0_i32 = arith.constant 0 : i32
    %c0_i32_0 = arith.constant 0 : i32
    %c0_i32_1 = arith.constant 0 : i32
    return %arg0, %c0_i32, %c0_i32_0 : i32, i32, i32
  }
  func.func @transform_1(%arg0: i32, %arg1: i32) -> (i32, i32, i32) {
    %c0_i32 = arith.constant 0 : i32
    %c0_i32_0 = arith.constant 0 : i32
    return %arg0, %arg1, %c0_i32 : i32, i32, i32
  }
  func.func @transform_2(%arg0: i32, %arg1: i32) -> (i32, i32, i32) {
    %c0_i32 = arith.constant 0 : i32
    %c0_i32_0 = arith.constant 0 : i32
    %c0_i32_1 = arith.constant 0 : i32
    return %arg0, %c0_i32, %c0_i32_0 : i32, i32, i32
  }
  func.func @transform_3(%arg0: i32, %arg1: i32) -> (i32, i32) {
    %c0_i32 = arith.constant 0 : i32
    %c0_i32_0 = arith.constant 0 : i32
    %c0_i32_1 = arith.constant 0 : i32
    return %c0_i32, %c0_i32_0 : i32, i32
  }
  func.func @transform_4(%arg0: i32, %arg1: i32) -> (i32, i32) {
    %c0_i32 = arith.constant 0 : i32
    %c0_i32_0 = arith.constant 0 : i32
    %c0_i32_1 = arith.constant 0 : i32
    return %c0_i32, %c0_i32_0 : i32, i32
  }
  func.func @transform_5(%arg0: i32, %arg1: i32) -> (i32, i32) {
    %c0_i32 = arith.constant 0 : i32
    %c0_i32_0 = arith.constant 0 : i32
    %c0_i32_1 = arith.constant 0 : i32
    return %c0_i32, %c0_i32_0 : i32, i32
  }
  func.func @transform_6(%arg0: i32, %arg1: i32) -> (i32, i32) {
    %c0_i32 = arith.constant 0 : i32
    %c0_i32_0 = arith.constant 0 : i32
    %c0_i32_1 = arith.constant 0 : i32
    return %c0_i32, %c0_i32_0 : i32, i32
  }
  func.func @transform_7(%arg0: i32, %arg1: i32) -> (i32, i32) {
    %c0_i32 = arith.constant 0 : i32
    %c0_i32_0 = arith.constant 0 : i32
    %c0_i32_1 = arith.constant 0 : i32
    return %c0_i32, %c0_i32_0 : i32, i32
  }
  func.func @transform_8(%arg0: i32, %arg1: i32) -> (i32, i32) {
    %c0_i32 = arith.constant 0 : i32
    %c0_i32_0 = arith.constant 0 : i32
    %c0_i32_1 = arith.constant 0 : i32
    return %c0_i32, %c0_i32_0 : i32, i32
  }
  func.func @transform_9(%arg0: i32, %arg1: i32) -> (i32, i32) {
    %c0_i32 = arith.constant 0 : i32
    %c0_i32_0 = arith.constant 0 : i32
    %c0_i32_1 = arith.constant 0 : i32
    return %c0_i32, %c0_i32_0 : i32, i32
  }
  func.func @transform_10(%arg0: i32, %arg1: i32) -> (i32, i32) {
    %c0_i32 = arith.constant 0 : i32
    %c0_i32_0 = arith.constant 0 : i32
    %c0_i32_1 = arith.constant 0 : i32
    return %c0_i32, %c0_i32_0 : i32, i32
  }
  func.func @transform_11(%arg0: i32, %arg1: i32) -> (i32, i32) {
    %c0_i32 = arith.constant 0 : i32
    %c0_i32_0 = arith.constant 0 : i32
    %c0_i32_1 = arith.constant 0 : i32
    return %c0_i32, %c0_i32_0 : i32, i32
  }
  func.func @transform_12(%arg0: i32, %arg1: i32) -> (i32, i32) {
    %c0_i32 = arith.constant 0 : i32
    %c0_i32_0 = arith.constant 0 : i32
    %c0_i32_1 = arith.constant 0 : i32
    return %c0_i32, %c0_i32_0 : i32, i32
  }
  func.func @transform_13(%arg0: i32, %arg1: i32) -> (i32, i32, i32) {
    %c0_i32 = arith.constant 0 : i32
    %c0_i32_0 = arith.constant 0 : i32
    return %arg0, %arg1, %c0_i32 : i32, i32, i32
  }
  func.func @transform_14(%arg0: i32, %arg1: i32) -> (i32, i32, i32) {
    %c0_i32 = arith.constant 0 : i32
    %c0_i32_0 = arith.constant 0 : i32
    return %arg0, %arg1, %c0_i32 : i32, i32, i32
  }
}

</mosaic_0001>

<bundles_post_ra>
// kernel: tpu_custom_call.1
= control target key start
LH: loop header
LB: loop body
LE: loop exit
PB: predicated region body
PF: predicated region fallthrough
CT: control target
= control target key end

     0   :  { %s4323_s0 = inlined_call_operand.hbm [shape: f32[4,1,8], index: 0, kind: input, shape index: {}]   ;;  %s4324_s1 = inlined_call_operand.hbm [shape: f32[4,8,32], index: 1, kind: input, shape index: {}]   ;;  %s4325_s2 = inlined_call_operand.hbm [shape: f32[4,8,32], index: 2, kind: input, shape index: {}]   ;;  %s4326_s3 = inlined_call_operand.hbm [shape: f32[32,32], index: 3, kind: input, shape index: {}]   ;;  %s4327_s4 = inlined_call_operand.vmem [shape: f32[1,32], index: 4, kind: input, shape index: {}]   ;;  %s4328_s5 = inlined_call_operand.hbm [shape: f32[32,32], index: 5, kind: input, shape index: {}]   ;;  %s4329_s6 = inlined_call_operand.vmem [shape: f32[1,32], index: 6, kind: input, shape index: {}]   ;;  %s4330_s7 = inlined_call_operand.hbm [shape: f32[32,32], index: 7, kind: input, shape index: {}]   ;;  %s4331_s8 = inlined_call_operand.hbm [shape: f32[1,32], index: 8, kind: input, shape index: {}]   ;;  %s4332_s9 = inlined_call_operand.vmem [shape: f32[32,32], index: 9, kind: input, shape index: {}]   ;;  %s4333_s10 = inlined_call_operand.vmem [shape: f32[1,32], index: 10, kind: input, shape index: {}]   ;;  %s4334_s11 = inlined_call_operand.vmem [shape: f32[1,32], index: 11, kind: input, shape index: {}]   ;;  %s4335_s12 = inlined_call_operand.vmem [shape: f32[1,32], index: 12, kind: input, shape index: {}]   ;;  %s4336_s13 = inlined_call_operand.hbm [shape: f32[4,8,32], index: 13, kind: output, shape index: {0}]   ;;  %s4337_s14 = inlined_call_operand.hbm [shape: f32[4,8,8], index: 14, kind: output, shape index: {1}]  }
   0x1   :  { %4372 = sst [smem:[#allocation36_spill]] %s4324_s1 }
   0x2   :  { %4373 = sst [smem:[#allocation37_spill]] %s4326_s3 }
   0x3   :  { %4374 = sst [smem:[#allocation38_spill]] %s4327_s4 }
   0x4   :  { %4375 = sst [smem:[#allocation39_spill]] %s4329_s6 }
   0x5   :  { %4376 = sst [smem:[#allocation40_spill]] %s4330_s7 }
   0x6   :  { %4377 = sst [smem:[#allocation41_spill]] %s4332_s9 }
   0x7   :  { %4378 = sst [smem:[#allocation42_spill]] %s4333_s10 }
   0x8   :  { %4379 = sst [smem:[#allocation43_spill]] %s4334_s11 }
   0x9   :  { %4380 = sst [smem:[#allocation44_spill]] %s4335_s12 }
   0xa   :  { %4381 = sst [smem:[#allocation45_spill]] %s4336_s13 }
   0xb   :  { %4382 = sst [smem:[#allocation46_spill]] %s4337_s14 }
   0xc   :  { %20 = vsyncpa [#allocation6], 0 }
   0xd   :  { %22 = vsyncpa [#allocation6 + $0x1], 0 }
   0xe   :  { %23 = vsyncpa [#allocation9], 0 }
   0xf   :  { %25 = vsyncpa [#allocation9 + $0x1], 0 }
  0x10   :  { %26 = vsyncpa [#allocation12], 0 }
  0x11   :  { %27 = vsyncpa [#allocation15], 0 }
  0x12   :  { %28 = vsyncpa [#allocation7], 0 }
  0x13   :  { %30 = vsyncpa [#allocation7 + $0x1], 0 }
  0x14   :  { %31 = vsyncpa [#allocation19], 0 }
  0x15   :  { %33 = vsyncpa [#allocation19 + $0x1], 0  ;;  %s3624_s29 = smov 0   ;;  %s3626_s30 = smov 0  }
  0x16   :  { %s3628_s15 = smov 0   ;;  %s3630_s16 = smov 0  }
  0x17   :  { %s3632_s17 = smov 0   ;;  %s3634_s18 = smov 0  }
  0x18 LB: > { %4383 = sst [smem:[#allocation26_spill]] %s3505_s29  ;;  %s3655_s19 = sadd.s32 4294967295, %s3525_s18   ;;  %s3525_s18 = sphi %s3634_s18, %s39_s18   ;;  %s3521_s17 = sphi %s3632_s17, %s4443_s17   ;;  %s3517_s16 = sphi %s3630_s16, %s4442_s16   ;;  %s3513_s15 = sphi %s3628_s15, %s4438_s15   ;;  %s3509_s30 = sphi %s3626_s30, %s4441_s30   ;;  %s3505_s29 = sphi %s3624_s29, %s4440_s29  }
  0x19   : > { %4384 = sst [smem:[#allocation27_spill]] %s3513_s15  ;;  %s2739_s20 = sadd.s32 4294967294, %s3525_s18  }
  0x1a   : > { %4385 = sst [smem:[#allocation28_spill]] %s3517_s16  ;;  %p71_p0 = scmp.ne.s32.totalorder %s3509_s30, %s3505_s29 }
  0x1b   : > { %4386 = sst [smem:[#allocation29_spill]] %s3525_s18  ;;  %p4341_p1 = scmp.eq.s32.totalorder %s3655_s19, 0 }
  0x1c   : > { %4387 = sst [smem:[#allocation30_spill]] %s3655_s19  ;;  %p367_p3 = scmp.eq.s32.totalorder %s2739_s20, 1 }
  0x1d   : > { %p3664_p4 = por %p4341_p1, %p71_p0  ;;  %p2740_p5 = scmp.ge.s32.totalorder %s3525_s18, 1 }
  0x1e   : > { %p3669_p6 = por %p367_p3, %p71_p0  ;;  %p402_p7 = scmp.lt.s32.totalorder %s3525_s18, 3 }
  0x1f   : > { %s4388_s21 = scalar_select %p3664_p4, 1, 0 }
  0x20   : > { %s4390_s22 = scalar_select %p3669_p6, 1, 0 }
  0x21   : > { %4389 = sst [smem:[#allocation31_spill]] %s4388_s21  ;;  %p3674_p8 = pnand %p2740_p5, %p402_p7 }
  0x22   : > { %4391 = sst [smem:[#allocation32_spill]] %s4390_s22  ;;  %s3527_s24 = smov [#allocation11]  }
  0x23   : > { %s4392_s23 = scalar_select %p3674_p8, 1, 0 }
  0x24   : > { %s414_s25 = sshll.u32 %s3527_s24, 4  ;;  %p3056_p9 = pneg %p3674_p8  ;;  %s3678_s25 = int_to_ptr.vmem [resolvable:$true] %s414_s25 }
  0x25   : > { %s3528_s27 = smov [#allocation14]   ;;  %s4394_s3 = sld [smem:[#allocation37_spill]] }
  0x26   : > { %p3685_p11 = pnand %p3056_p9, %p4341_p1  ;;  %s446_s28 = sshll.u32 %s3528_s27, 4  ;;  %s3689_s28 = int_to_ptr.vmem [resolvable:$true] %s446_s28 }
  0x28   : > { %s4393_s26 = scalar_select %p3685_p11, 1, 0 }
  0x29   : > { %p3699_p13 = pneg %p3685_p11 }
  0x2b   : > { %s3197_s29 = scalar_lea.hbm %s4394_s3, 512 }
  0x2c   : > { %p3198_p12 = scmp.ne.s32.totalorder %s4394_s3, %s3197_s29  ;;  %p3204_p5 = scmp.lt.u32.totalorder %s3197_s29, %s4394_s3 }
  0x2d   : > { %s4395_s12 = scalar_select %p3699_p13, 1, 0 }
  0x2e   : > { %p3200_p0 = pnand %p3699_p13, %p3198_p12 }
  0x30   : > { %p3201_p3 = pneg %p3200_p0 }
  0x32   : > { %p3206_p7 = pnand %p3204_p5, %p3201_p3 }
  0x34   : > { %3209 = shalt.err (!%p3206_p7)
}
  0x35   : > { %s3210_s13 = scalar_lea.vmem %s3678_s25, 512  ;;  %p3218_p2 = scmp.lt.s32.totalorder %s3678_s25, %s3678_s25 }
  0x36   : > { %p3211_p9 = scmp.ne.s32.totalorder %s3678_s25, %s3210_s13  ;;  %p3219_p6 = scmp.lt.s32.totalorder %s3210_s13, %s3210_s13 }
  0x38   : > { %p3213_p10 = pnand %p3211_p9, %p3699_p13  ;;  %p3220_p12 = por %p3219_p6, %p3218_p2 }
  0x3a   : > { %p3214_p1 = pneg %p3213_p10 }
  0x3c   : > { %p3221_p0 = pnand %p3220_p12, %p3214_p1 }
  0x3e   : > { %3224 = shalt.err (!%p3221_p0)
}
  0x3f   : > { %s4345_s22 = smov 128   ;;  %s4347_s11 = smov 8  }
  0x40   : > { %3059 = dma.hbm_to_vmem [thread:$0]  (!%p3685_p11), %s4394_s3, 512, %s3678_s25, [#allocation12], %s4345_s22, %s4345_s22, %s4347_s11  }
  0x41   : > { %s4396_s7 = sld [smem:[#allocation40_spill]] }
  0x47   : > { %s3225_s13 = scalar_lea.hbm %s4396_s7, 512 }
  0x48   : > { %p3226_p1 = scmp.ne.s32.totalorder %s4396_s7, %s3225_s13  ;;  %p3232_p10 = scmp.lt.u32.totalorder %s3225_s13, %s4396_s7 }
  0x4a   : > { %p3228_p2 = pnand %p3226_p1, %p3699_p13 }
  0x4c   : > { %p3229_p6 = pneg %p3228_p2 }
  0x4e   : > { %p3234_p3 = pnand %p3232_p10, %p3229_p6 }
  0x50   : > { %3237 = shalt.err (!%p3234_p3)
}
  0x51   : > { %s3238_s25 = scalar_lea.vmem %s3689_s28, 512  ;;  %p3246_p12 = scmp.lt.s32.totalorder %s3689_s28, %s3689_s28 }
  0x52   : > { %p3239_p5 = scmp.ne.s32.totalorder %s3689_s28, %s3238_s25  ;;  %p3247_p0 = scmp.lt.s32.totalorder %s3238_s25, %s3238_s25 }
  0x54   : > { %p3241_p7 = pnand %p3239_p5, %p3699_p13  ;;  %p3248_p1 = por %p3247_p0, %p3246_p12 }
  0x56   : > { %p3242_p9 = pneg %p3241_p7 }
  0x58   : > { %p3249_p2 = pnand %p3248_p1, %p3242_p9 }
  0x5a   : > { %3252 = shalt.err (!%p3249_p2)
}
  0x5b   : > { %3065 = dma.hbm_to_vmem [thread:$0]  (!%p3685_p11), %s4396_s7, 512, %s3689_s28, [#allocation15], %s4345_s22, %s4345_s22, %s4347_s11  }
  0x5c   : > { %s51_s14 = sadd.s32 1, %s3521_s17  ;;  %s58_s16 = sadd.s32 1, %s3513_s15 }
  0x5d   : > { %p53_p6 = scmp.ge.s32.totalorder %s51_s14, 2  ;;  %p65_p10 = scmp.ne.s32.totalorder %s3513_s15, %s3509_s30 }
  0x5e   : > { %p66_p3 = scmp.eq.s32.totalorder %s3525_s18, 0  ;;  %p3090_p5 = scmp.lt.s32.totalorder %s3525_s18, 2 }
  0x5f   : > { %s4445_s14 = smov (%p53_p6, %s51_s14), 0  ;;  %p4398_p9 = scmp.eq.s32.totalorder %s3655_s19, 1 }
  0x60   : > { %4397 = sst [smem:[#allocation33_spill]] %s4445_s14  ;;  %p67_p7 = por %p66_p3, %p65_p10 }
  0x61   : > { %p3759_p12 = por %p4398_p9, %p65_p10  ;;  %s55_s20 = ssub.s32 %s3521_s17, %s4445_s14 }
  0x62   : > { %s3766_s28 = sand.u32 1, %s3513_s15   ;;  %p56_p0 = scmp.eq.s32.totalorder %s55_s20, 0 }
  0x63   : > { %s4399_s29 = scalar_select %p3759_p12, 1, 0 }
  0x64   : > { %p3768_p1 = pnand %p3090_p5, %p67_p7  ;;  %s504_s27 = sand.u32 1, %s3525_s18  }
  0x65   : > { %4400 = sst [smem:[#allocation34_spill]] %s4399_s29  ;;  %s4350_s13 = sshll.u32 %s3766_s28, 4 }
  0x66   : > { %s4401_s24 = scalar_select %p3768_p1, 1, 0 }
  0x67   : > { %s3775_s25 = scalar_select %p56_p0, %s3513_s15, %s58_s16  }
  0x68   : > { %s4351_s9 = sshll.u32 %s3521_s17, 8  ;;  %s4403_s1 = sld [smem:[#allocation36_spill]] }
  0x69   : > { %4402 = sst [smem:[#allocation35_spill]] %s3775_s25  ;;  %s508_s20 = scalar_lea.vmem [#allocation8], %s4350_s13 }
  0x6a   : > { %s516_s3 = sshll.u32 %s508_s20, 4  ;;  %s3789_s7 = scalar_lea.sflag [#allocation9], %s504_s27  ;;  %s3787_s3 = int_to_ptr.vmem [resolvable:$true] %s516_s3 }
  0x6b   : > { %p3795_p6 = pneg %p3768_p1 }
  0x6d   : > { %s4404_s14 = scalar_select %p3795_p6, 1, 0 }
  0x6e   : > { %s3783_s11 = scalar_lea.hbm %s4403_s1, %s4351_s9  ;;  %s3258_s13 = scalar_lea.hbm %s4403_s1, 512 }
  0x6f   : > { %s3253_s16 = scalar_lea.hbm %s3783_s11, 256  ;;  %p3259_p5 = scmp.lt.u32.totalorder %s3783_s11, %s4403_s1 }
  0x70   : > { %p3254_p2 = scmp.ne.s32.totalorder %s3783_s11, %s3253_s16  ;;  %p3260_p7 = scmp.lt.u32.totalorder %s3258_s13, %s3253_s16 }
  0x71   : > { %p3262_p0 = scmp.lt.u32.totalorder %s3253_s16, %s3783_s11 }
  0x72   : > { %p3256_p10 = pnand %p3795_p6, %p3254_p2  ;;  %p3261_p9 = por %p3260_p7, %p3259_p5 }
  0x74   : > { %p3257_p3 = pneg %p3256_p10  ;;  %p3263_p12 = por %p3262_p0, %p3261_p9 }
  0x76   : > { %p3264_p4 = pnand %p3263_p12, %p3257_p3 }
  0x78   : > { %3267 = shalt.err (!%p3264_p4)
}
  0x79   : > { %s3268_s27 = scalar_lea.vmem %s3787_s3, 256  ;;  %s3531_s22 = smov [#allocation8]  }
  0x7a   : > { %p3269_p2 = scmp.ne.s32.totalorder %s3787_s3, %s3268_s27  ;;  %s3273_s10 = sshll.u32 %s3531_s22, 4  ;;  %s3274_s10 = int_to_ptr.vmem [resolvable:$false] %s3273_s10 }
  0x7b   : > { %s3275_s9 = scalar_lea.vmem %s3274_s10, 512  ;;  %p3276_p11 = scmp.lt.s32.totalorder %s3787_s3, %s3274_s10 }
  0x7c   : > { %p3271_p10 = pnand %p3269_p2, %p3795_p6  ;;  %p3277_p13 = scmp.lt.s32.totalorder %s3275_s9, %s3268_s27 }
  0x7e   : > { %p3272_p8 = pneg %p3271_p10  ;;  %p3278_p5 = por %p3277_p13, %p3276_p11 }
  0x80   : > { %p3279_p7 = pnand %p3278_p5, %p3272_p8 }
  0x82   : > { %3282 = shalt.err (!%p3279_p7)
}
  0x83   : > { %s4405_s13 = smov 8   ;;  %s4406_s16 = smov 128  }
  0x84   : > { %3075 = dma.hbm_to_vmem [thread:$0]  (!%p3768_p1), %s3783_s11, 256, %s3787_s3, %s3789_s7, %s4406_s16, %s4406_s16, %s4405_s13  }
  0x85   : > { %s4407_s20 = sshll.u32 %s3521_s17, 8  ;;  %s4408_s10 = sshll.u32 %s3766_s28, 4 }
  0x86   : > { %s3827_s27 = scalar_lea.hbm %s4325_s2, %s4407_s20  ;;  %s530_s9 = scalar_lea.vmem [#allocation10], %s4408_s10 }
  0x87   : > { %s537_s25 = sshll.u32 %s530_s9, 4  ;;  %s3532_s15 = smov [#allocation13]   ;;  %s3831_s25 = int_to_ptr.vmem [resolvable:$true] %s537_s25 }
  0x88   : > { %s430_s18 = sshll.u32 %s3532_s15, 4  ;;  %s3533_s29 = smov [#allocation16]   ;;  %s431_s18 = int_to_ptr.vmem [resolvable:$true] %s430_s18 }
  0x89   : > { %s460_s4 = sshll.u32 %s3533_s29, 4  ;;  %s3283_s3 = scalar_lea.hbm %s4328_s5, 512  ;;  %s461_s4 = int_to_ptr.vmem [resolvable:$true] %s460_s4 }
  0x8a   : > { %p3284_p4 = scmp.ne.s32.totalorder %s4328_s5, %s3283_s3  ;;  %p4409_p8 = scmp.ne.s32.totalorder %s4395_s12, 0 }
  0x8b   : > { %p3290_p12 = scmp.lt.u32.totalorder %s3283_s3, %s4328_s5 }
  0x8c   : > { %p3286_p11 = pnand %p3284_p4, %p4409_p8 }
  0x8e   : > { %p3287_p13 = pneg %p3286_p11 }
  0x90   : > { %p3292_p3 = pnand %p3290_p12, %p3287_p13 }
  0x92   : > { %3295 = shalt.err (!%p3292_p3)
}
  0x93   : > { %s3296_s15 = scalar_lea.vmem %s431_s18, 512  ;;  %p3304_p10 = scmp.lt.s32.totalorder %s431_s18, %s431_s18 }
  0x94   : > { %p3297_p9 = scmp.ne.s32.totalorder %s431_s18, %s3296_s15  ;;  %p3305_p5 = scmp.lt.s32.totalorder %s3296_s15, %s3296_s15 }
  0x96   : > { %p3299_p0 = pnand %p3297_p9, %p4409_p8  ;;  %p3306_p7 = por %p3305_p5, %p3304_p10 }
  0x98   : > { %p3300_p2 = pneg %p3299_p0 }
  0x9a   : > { %p3307_p1 = pnand %p3306_p7, %p3300_p2 }
  0x9c   : > { %3310 = shalt.err (!%p3307_p1)
}
  0x9d   : > { %p4410_p4 = scmp.ne.s32.totalorder %s4393_s26, 0  ;;  %s3311_s22 = scalar_lea.hbm %s4331_s8, 16 }
  0x9e   : > { %p3312_p11 = scmp.ne.s32.totalorder %s4331_s8, %s3311_s22  ;;  %p3318_p12 = scmp.lt.u32.totalorder %s3311_s22, %s4331_s8 }
  0x9f   : > { %3062 = dma.hbm_to_vmem [thread:$0]  (!%p4410_p4), %s4328_s5, 512, %s431_s18, [#allocation12], %s4406_s16, %s4406_s16, %s4405_s13  }
  0xa0   : > { %p3314_p1 = pnand %p3312_p11, %p4409_p8 }
  0xa2   : > { %p3315_p13 = pneg %p3314_p1 }
  0xa4   : > { %p3320_p3 = pnand %p3318_p12, %p3315_p13 }
  0xa6   : > { %3323 = shalt.err (!%p3320_p3)
}
  0xa7   : > { %s3324_s1 = scalar_lea.vmem %s461_s4, 16  ;;  %s3331_s18 = scalar_lea.vmem %s461_s4, 32 }
  0xa8   : > { %p3325_p9 = scmp.ne.s32.totalorder %s461_s4, %s3324_s1  ;;  %p3332_p10 = scmp.lt.s32.totalorder %s461_s4, %s461_s4 }
  0xa9   : > { %p3333_p5 = scmp.lt.s32.totalorder %s3331_s18, %s3324_s1 }
  0xaa   : > { %p3327_p0 = pnand %p3325_p9, %p4409_p8 }
  0xab   : > { %p3334_p7 = por %p3333_p5, %p3332_p10 }
  0xac   : > { %p3328_p2 = pneg %p3327_p0 }
  0xae   : > { %p3335_p6 = pnand %p3334_p7, %p3328_p2 }
  0xb0   : > { %3338 = shalt.err (!%p3335_p6)
}
  0xb1   : > { %3068 = dma.hbm_to_vmem [thread:$0]  (!%p4410_p4), %s4331_s8, 16, %s461_s4, [#allocation15]  }
  0xb2   : > { %s2746_s6 = sshll.u32 %s3766_s28, 1  ;;  %s2813_s12 = sshll.u32 %s3521_s17, 5 }
  0xb3   : > { %s3877_s29 = scalar_lea.hbm %s4323_s0, %s2813_s12  ;;  %s487_s26 = scalar_lea.vmem [#allocation5], %s2746_s6 }
  0xb4   : > { %s494_s22 = sshll.u32 %s487_s26, 4  ;;  %s484_s10 = scalar_lea.sflag [#allocation6], %s3766_s28  ;;  %s3879_s22 = int_to_ptr.vmem [resolvable:$true] %s494_s22 }
  0xb5   : > { %s3339_s9 = scalar_lea.hbm %s3877_s29, 32  ;;  %p4411_p8 = scmp.ne.s32.totalorder %s4404_s14, 0 }
  0xb6   : > { %p3340_p6 = scmp.ne.s32.totalorder %s3877_s29, %s3339_s9  ;;  %s3344_s11 = scalar_lea.hbm %s4323_s0, 64 }
  0xb7   : > { %p3345_p1 = scmp.lt.u32.totalorder %s3877_s29, %s4323_s0  ;;  %p3346_p13 = scmp.lt.u32.totalorder %s3344_s11, %s3339_s9 }
  0xb8   : > { %p3342_p4 = pnand %p3340_p6, %p4411_p8  ;;  %p3348_p3 = scmp.lt.u32.totalorder %s3339_s9, %s3877_s29 }
  0xb9   : > { %p3347_p12 = por %p3346_p13, %p3345_p1 }
  0xba   : > { %p3343_p11 = pneg %p3342_p4 }
  0xbb   : > { %p3349_p9 = por %p3348_p3, %p3347_p12 }
  0xbd   : > { %p3350_p0 = pnand %p3349_p9, %p3343_p11 }
  0xbf   : > { %3353 = shalt.err (!%p3350_p0)
}
  0xc0   : > { %s3354_s20 = scalar_lea.vmem %s3879_s22, 32  ;;  %s3534_s15 = smov [#allocation5]  }
  0xc1   : > { %p3355_p2 = scmp.ne.s32.totalorder %s3879_s22, %s3354_s20  ;;  %s3359_s6 = sshll.u32 %s3534_s15, 4  ;;  %s3360_s6 = int_to_ptr.vmem [resolvable:$false] %s3359_s6 }
  0xc2   : > { %s3361_s12 = scalar_lea.vmem %s3360_s6, 64  ;;  %p3362_p7 = scmp.lt.s32.totalorder %s3879_s22, %s3360_s6 }
  0xc3   : > { %p3357_p10 = pnand %p3355_p2, %p4411_p8  ;;  %p3363_p6 = scmp.lt.s32.totalorder %s3361_s12, %s3354_s20 }
  0xc5   : > { %p3358_p5 = pneg %p3357_p10  ;;  %p3364_p4 = por %p3363_p6, %p3362_p7 }
  0xc7   : > { %p3365_p1 = pnand %p3364_p4, %p3358_p5 }
  0xc9   : > { %3368 = shalt.err (!%p3365_p1)
}
  0xca   : > { %s3535_s19 = smov 16   ;;  %s3536_s21 = smov 1  }
  0xcb   : > { %p4412_p11 = scmp.ne.s32.totalorder %s4401_s24, 0  ;;  %s3369_s26 = scalar_lea.hbm %s3827_s27, 256 }
  0xcc   : > { %p3370_p13 = scmp.ne.s32.totalorder %s3827_s27, %s3369_s26  ;;  %s3374_s3 = scalar_lea.hbm %s4325_s2, 512 }
  0xcd   : > { %3072 = dma.hbm_to_vmem [thread:$0]  (!%p4412_p11), %s3877_s29, 32, %s3879_s22, %s484_s10, %s3535_s19, %s3535_s19, %s3536_s21  }
  0xce   : > { %p3372_p12 = pnand %p3370_p13, %p4411_p8  ;;  %p3375_p9 = scmp.lt.u32.totalorder %s3827_s27, %s4325_s2 }
  0xcf   : > { %p3376_p0 = scmp.lt.u32.totalorder %s3374_s3, %s3369_s26  ;;  %p3378_p10 = scmp.lt.u32.totalorder %s3369_s26, %s3827_s27 }
  0xd0   : > { %p3373_p3 = pneg %p3372_p12 }
  0xd1   : > { %p3377_p2 = por %p3376_p0, %p3375_p9 }
  0xd3   : > { %p3379_p5 = por %p3378_p10, %p3377_p2 }
  0xd5   : > { %p3380_p7 = pnand %p3379_p5, %p3373_p3 }
  0xd7   : > { %3383 = shalt.err (!%p3380_p7)
}
  0xd8   : > { %s3384_s28 = scalar_lea.vmem %s3831_s25, 256  ;;  %s3537_s29 = smov [#allocation10]  }
  0xd9   : > { %p3385_p6 = scmp.ne.s32.totalorder %s3831_s25, %s3384_s28  ;;  %s3389_s22 = sshll.u32 %s3537_s29, 4  ;;  %s3390_s22 = int_to_ptr.vmem [resolvable:$false] %s3389_s22 }
  0xda   : > { %s3391_s10 = scalar_lea.vmem %s3390_s22, 512  ;;  %p3392_p13 = scmp.lt.s32.totalorder %s3831_s25, %s3390_s22 }
  0xdb   : > { %p3387_p4 = pnand %p3385_p6, %p4411_p8  ;;  %p3393_p12 = scmp.lt.s32.totalorder %s3391_s10, %s3384_s28 }
  0xdd   : > { %p3388_p1 = pneg %p3387_p4  ;;  %p3394_p9 = por %p3393_p12, %p3392_p13 }
  0xdf   : > { %p3395_p0 = pnand %p3394_p9, %p3388_p1 }
  0xe1   : > { %3398 = shalt.err (!%p3395_p0)
}
  0xe2   : > { %3078 = dma.hbm_to_vmem [thread:$0]  (!%p4412_p11), %s3827_s27, 256, %s3831_s25, %s3789_s7, %s4406_s16, %s4406_s16, %s4405_s13  }
  0xe3   : > { %p4413_p8 = scmp.ne.s32.totalorder %s4392_s23, 0 }
  0xe4   : > { %s4414_s14 = sld [smem:[#allocation31_spill]] (!%p4413_p8)  ;;  %s3933_s18 = sand.u32 (!%p4413_p8), 1, %s3509_s30  }
  0xe5   : > { %549 = sbr.rel (%p4413_p8) target bundleno = 3545 (0xdd9), region = 72  ;;  %s2756_s20 = sshll.u32 (!%p4413_p8), %s3933_s18, 1 }
  0xe6   : > { %s552_s15 = scalar_lea.sflag (!%p4413_p8), [#allocation6], %s3933_s18  ;;  %s3937_s6 = scalar_lea.vmem (!%p4413_p8), [#allocation5], %s2756_s20 }
  0xea   : > { %p4415_p3 = scmp.ne.s32.totalorder (!%p4413_p8), %s4414_s14, 0 }
  0xec   : > { %3480 = dma.done.wait (%p4415_p3), %s552_s15, 32  }
  0xed   : > { %3482 = vsyncadd (%p4415_p3), %s552_s15, 4294967264  ;;  %s4416_s24 = sld [smem:[#allocation30_spill]]  ;;  %s3945_s23 = sshll.u32 %s3933_s18, 4 }
  0xee   : > { %s564_s13 = scalar_lea.vmem [#allocation8], %s3945_s23 }
  0xf3   : > { %s560_s7 = sand.u32 1, %s4416_s24  }
  0xf4   : > { %s561_s25 = scalar_lea.sflag [#allocation9], %s560_s7 }
  0xf5   : > { %3484 = dma.done.wait (%p4415_p3), %s561_s25, 512  }
  0xf6   : > { %3486 = vsyncadd (%p4415_p3), %s561_s25, 4294966784  ;;  %s573_s16 = scalar_lea.vmem [#allocation10], %s3945_s23  ;;  %p4417_p11 = scmp.eq.s32.totalorder %s4416_s24, 0 }
  0xf8   : > { %3488 = dma.done.wait (%p4417_p11), [#allocation12], 1024   ;;  %p4418_p2 = pmov %p4417_p11 }
  0xfa   : > { %3490 = vsyncadd (%p4418_p2), [#allocation12], 4294966272  ;;  %p4419_p10 = pmov %p4418_p2 }
  0xfb   : > { %p4420_p5 = pmov %p4418_p2 }
  0xfc   : > { %3492 = dma.done.wait (%p4419_p10), [#allocation15], 528  }
  0xfd   : > { %3494 = vsyncadd (%p4420_p5), [#allocation15], 4294966768  ;;  %vm671_vm0 = vcmask 261120   ;;  %v660_v0 = vld [vmem:[#allocation13] sm:$0xff]  ;;  %v661_v1 = vld [vmem:[#allocation13 + $0x8] sm:$0xff]  ;;  %v3538_v22 = vmov 0.0  }
  0xfe   : > { %v662_v2 = vld [vmem:[#allocation13 + $0x10] sm:$0xff]  ;;  %v2998_v3 = vpack.c.bf16 %v661_v1, %v660_v0  ;;  %v663_v4 = vld [vmem:[#allocation13 + $0x18] sm:$0xff]  ;;  %v845_v7 = vld [vmem:[#allocation11] sm:$0xff]  ;;  %vm3539_vm1 = vmmov 0   ;;  %s4421_s19 = sld [smem:[#allocation39_spill]]  ;;  %s4422_s9 = sld [smem:[#allocation38_spill]] }
  0xff   : > { %v658_v5 = vld [vmem:[%s573_s16] sm:$0xff]  ;;  %v3002_v6 = vpack.c.bf16 %v663_v4, %v662_v2  ;;  %v846_v8 = vld [vmem:[#allocation11 + $0x8] sm:$0xff]  ;;  %v848_v14 = vld [vmem:[#allocation11 + $0x18] sm:$0xff]  ;;  %vm952_vm2 = vcmask 64512   ;;  %s3540_s4 = smov 120   ;;  %s4036_s3 = scalar_lea.vmem [#allocation18], %s3945_s23 }
 0x100   : > { %2882 = vmatprep.mubr.msk.f32.mxu0 %vm671_vm0, %v658_v5  ;;  %2893 = vmatprep.mubr.msk.f32.mxu1 %vm671_vm0, %v658_v5  ;;  %v753_v9 = vld [vmem:[#allocation14] sm:$0xff]  ;;  %v754_v10 = vld [vmem:[#allocation14 + $0x8] sm:$0xff]  ;;  %v3014_v11 = vpack.c.bf16 %v846_v8, %v845_v7  ;;  %v847_v13 = vld [vmem:[#allocation11 + $0x10] sm:$0xff]  ;;  %953 = vst.msk [vmem:[%s4036_s3] sm:$0xff] %vm952_vm2, %v3538_v22  ;;  %s3541_s11 = smov 112   ;;  %s3542_s1 = smov 104  }
 0x101   : > { %2999 = vmatprep.subr.bf16.mxu0 %v2998_v3  ;;  %v3006_v12 = vpack.c.bf16 %v754_v10, %v753_v9  ;;  %v659_v15 = vld [vmem:[%s573_s16 + $0x8] sm:$0xff]  ;;  %v3018_v16 = vpack.c.bf16 %v848_v14, %v847_v13  ;;  %v3965_v17 = vld [vmem:[%s564_s13] sm:$0xff]  ;;  %954 = vst.msk [vmem:[%s4036_s3 + $0x8] sm:$0xff] %vm952_vm2, %v3538_v22  ;;  %s3543_s28 = smov 8   ;;  %s3544_s29 = smov 16   ;;  %vm1639_vm3 = vcmask 130112  }
 0x102   : > { %3001 = vmatpush3.bf16.msra.mxu0 %v2998_v3  ;;  %v3972_v18 = vld [vmem:[%s564_s13 + $0x8] sm:$0xff]  ;;  %v755_v19 = vld [vmem:[#allocation14 + $0x10] sm:$0xff]  ;;  %v2768_v35 = vld [vmem:[#allocation16] ss:$0 sm:$0xff]  ;;  %vm1994_vm4 = vcmask 195712   ;;  %s4423_s14 = sld [smem:[#allocation41_spill]] }
 0x103   : > { %3003 = vmatprep.subr.bf16.mxu0 %v3002_v6  ;;  %3007 = vmatprep.subr.bf16.mxu1 %v3006_v12  ;;  %v756_v20 = vld [vmem:[#allocation14 + $0x18] sm:$0xff]  ;;  %s3545_s13 = smov 24   ;;  %vm2349_vm5 = vcmask 261312   ;;  %s4424_s12 = sld [smem:[#allocation42_spill]] }
 0x104   : > { %3009 = vmatpush3.bf16.msra.mxu1 %v3006_v12  ;;  %v3010_v21 = vpack.c.bf16 %v756_v20, %v755_v19  ;;  %v2765_v23 = vld [vmem:[%s4421_s19] ss:$0 sm:$0xff]  ;;  %v4024_v41 = vld [vmem:[%s3937_s6] ss:$0 sm:$0xff]  ;;  %v4028_v45 = vld [vmem:[%s3937_s6 + $0x1] ss:$0 sm:$0xff] }
 0x105   : > { %v2771_v29 = vld [vmem:[%s4422_s9] ss:$0 sm:$0xff]  ;;  %s4425_s19 = sld [smem:[#allocation28_spill]]  ;;  %s4426_s21 = sld [smem:[#allocation34_spill]] }
 0x106   : > { %3005 = vmatpush3.bf16.msra.mxu0 %v3002_v6  ;;  %3011 = vmatprep.subr.bf16.mxu1 %v3010_v21  ;;  %s2507_s22 = scalar_lea.sflag [#allocation19], %s3933_s18  ;;  %s3546_s20 = smov [#allocation18]  }
 0x107   : > { %3015 = vmatprep.subr.bf16.mxu0 %v3014_v11  ;;  %v1131_v3 = vld [vmem:[%s4036_s3] sm:$0xff]  ;;  %s3403_s15 = sshll.u32 %s3546_s20, 4  ;;  %s3404_s15 = int_to_ptr.vmem [resolvable:$false] %s3403_s15 }
 0x108   : > { %3013 = vmatpush3.bf16.msra.mxu1 %v3010_v21  ;;  %v1132_v8 = vld [vmem:[%s4036_s3 + $0x8] sm:$0xff]  ;;  %s3405_s6 = scalar_lea.vmem %s3404_s15, 512 }
 0x109   : > { %2883 = vmatmul.mubr.msk.f32.vlgmr.msra.gmra.mrb[0].mxu0 %vm671_vm0, %v659_v15  ;;  %2907 = vmatprep.subr.mxu1 %v3538_v22 }
 0x10a   : > { %3017 = vmatpush3.bf16.msra.mxu0 %v3014_v11  ;;  %2904 = vmatprep.mubr.msk.f32.mxu0 %vm671_vm0, %v3965_v17 }
 0x10b   : > { %3019 = vmatprep.subr.bf16.mxu0 %v3018_v16  ;;  %2894 = vmatmul.mubr.msk.f32.vlgmr.msra.gmra.mrb[0].mxu1 %vm671_vm0, %v659_v15  ;;  %s2816_s26 = sshll.u32 %s4425_s19, 8  ;;  %p4428_p6 = scmp.ne.s32.totalorder %s4426_s21, 0 }
 0x10c   : > { %2909 = vmatprep.mubr.msk.f32.mxu1 %vm3539_vm1, %v3538_v22 }
 0x10e   : > { %3021 = vmatpush3.bf16.msra.mxu0 %v3018_v16 }
 0x10f   : > { %2927 = vmatprep.subr.mxu0 %v3538_v22 }
 0x111   : > { %2905 = vmatmul.mubr.msk.f32.vlgmr.msra.gmra.mrb[2].mxu0 %vm671_vm0, %v3972_v18 }
 0x112   : > { %2929 = vmatprep.mubr.msk.f32.mxu0 %vm3539_vm1, %v3538_v22 }
 0x1dc   : > { %v2884_v24 = vpop.f32.mrb[0].mxu0 }
 0x1dd   : > { %v750_v25 = vadd.f32 %v2884_v24, %v2765_v23  ;;  %v744_v26 = vpop.f32.mrb[1].mxu0 }
 0x1de   : > { %v745_v27 = vadd.f32 %v2765_v23, %v744_v26  ;;  %v2895_v36 = vpop.f32.mrb[0].mxu1 }
 0x1df   : > { %840 = vst.msk [vmem:[#allocation2 + $0x8] sm:$0xff] %vm671_vm0, %v750_v25  ;;  %v836_v37 = vadd.f32 %v2895_v36, %v2768_v35  ;;  %v830_v38 = vpop.f32.mrb[1].mxu1 }
 0x1e0   : > { %839 = vst.msk [vmem:[#allocation2] sm:$0xff] %vm671_vm0, %v745_v27  ;;  %v831_v39 = vadd.f32 %v2768_v35, %v830_v38 }
 0x1e1   : > { %842 = vst.msk [vmem:[#allocation3 + $0x8] sm:$0xff] %vm671_vm0, %v836_v37 }
 0x1e2   : > { %841 = vst.msk [vmem:[#allocation3] sm:$0xff] %vm671_vm0, %v831_v39 }
 0x1e4   : > { %v2906_v28 = vpop.f32.mrb[2].mxu0 }
 0x1e5   : > { %v929_v30 = vpop.f32.mrb[3].mxu0  ;;  %v4010_v34 = vadd.f32 %v2906_v28, %v2771_v29 }
 0x1e6   : > { %v3991_v31 = vld [vmem:[#allocation2 + $0x8] sm:$0xff]  ;;  %v3995_v32 = vadd.f32 %v2771_v29, %v929_v30 }
 0x1e7   : > { %1371 = vrot.lane.b32.xlu1 %v3991_v31, %s3540_s4  ;;  %v3997_v33 = vld [vmem:[#allocation2] sm:$0xff] }
 0x1e8   : > { %2908 = vmatpush3.xpose.msk.msra.mxu1 %vm952_vm2, %v3997_v33  ;;  %v4055_v6 = vld [vmem:[#allocation3 + $0x8] sm:$0xff] }
 0x1e9   : > { %2912 = vmatprep.subr.mxu1 %v3538_v22  ;;  %v4019_v40 = vld [vmem:[#allocation3] sm:$0xff] }
 0x1eb   : > { %1289 = vrot.lane.b32.xlu1 %v3995_v32, %s3540_s4  ;;  %2910 = vmatmul.mubr.msk.f32.vlgmr.msra.gmra.mrb[2].mxu1 %vm952_vm2, %v3995_v32 }
 0x1ec   : > { %2913 = vmatpush3.xpose.msk.msra.mxu1 %vm952_vm2, %v3991_v31  ;;  %2914 = vmatprep.mubr.msk.f32.mxu1 %vm3539_vm1, %v3538_v22 }
 0x1ed   : > { %2917 = vmatprep.subr.mxu1 %v3538_v22 }
 0x1ef   : > { %2915 = vmatmul.mubr.msk.f32.vlgmr.msra.gmra.mrb[4].mxu1 %vm952_vm2, %v4010_v34 }
 0x1f0   : > { %2919 = vmatprep.mubr.msk.f32.mxu1 %vm3539_vm1, %v3538_v22  ;;  %2918 = vmatpush3.msra.mxu1 %v4019_v40 }
 0x1f1   : > { %2922 = vmatprep.subr.mxu1 %v3538_v22 }
 0x259   : > { %v1372_v55 = vpop.permute.xlu1 %1371 }
 0x25d   : > { %v1290_v59 = vpop.permute.xlu1 %1289 }
 0x2be   : > { %v1029_v42 = vpop.f32.mrb[2].mxu1 }
 0x2bf   : > { %v1030_v43 = vadd.f32 %v4024_v41, %v1029_v42  ;;  %v2911_v44 = vpop.f32.mrb[3].mxu1 }
 0x2c1   : > { %v1109_v46 = vsel %vm952_vm2, %v1030_v43, -inf }
 0x2c2   : > { %1110 = vmax.xlane.f32.xlu0 %v1109_v46  ;;  %v1105_v47 = vpop.f32.mrb[4].mxu1 }
 0x2c3   : > { %v1106_v48 = vadd.f32 %v4028_v45, %v1105_v47  ;;  %v2916_v49 = vpop.f32.mrb[5].mxu1 }
 0x2c5   : > { %v1112_v50 = vsel %vm952_vm2, %v1106_v48, -inf }
 0x2c6   : > { %1113 = vmax.xlane.f32.xlu0 %v1112_v50 }
 0x2dc   : > { %1292 = vrot.lane.b32.xlu0 %v3997_v33, %s3540_s4 }
 0x34f   : > { %v1111_v51 = vpop.xlane.xlu0 %1110 }
 0x350   : > { %v1115_v52 = vsub.f32 %v1030_v43, %v1111_v51 }
 0x352   : > { %v1117_v53 = vmul.f32 1.442695, %v1115_v52 }
 0x353   : > { %v1114_v54 = vpop.xlane.xlu0 %1113 }
 0x354   : > { %3161 = vpow2.f32 %v1117_v53  ;;  %v1116_v56 = vsub.f32 %v1106_v48, %v1114_v54 }
 0x356   : > { %v1119_v57 = vmul.f32 1.442695, %v1116_v56 }
 0x357   : > { %v1293_v58 = vpop.permute.xlu0 %1292 }
 0x358   : > { %3163 = vpow2.f32 %v1119_v57  ;;  %2928 = vmatpush3.xpose.msk.msra.mxu0 %vm952_vm2, %v1293_v58 }
 0x359   : > { %2937 = vmatprep.subr.mxu0 %v3538_v22 }
 0x35b   : > { %2930 = vmatmul.mubr.msk.f32.vlgmr.msra.gmra.mrb[4].mxu0 %vm952_vm2, %v1290_v59 }
 0x35c   : > { %2939 = vmatprep.mubr.msk.f32.mxu0 %vm3539_vm1, %v3538_v22 }
 0x35e   : > { %v3162_v60 = vpop.eup %3161 }
 0x35f   : > { %v1121_v61 = vsel %vm952_vm2, %v3162_v60, 0.0 }
 0x360   : > { %1122 = vadd.xlane.f32.xlu1 %v1121_v61 }
 0x362   : > { %v3164_v62 = vpop.eup %3163 }
 0x363   : > { %v1124_v63 = vsel %vm952_vm2, %v3164_v62, 0.0 }
 0x364   : > { %1125 = vadd.xlane.f32.xlu1 %v1124_v63 }
 0x375   : > { %1368 = vrot.lane.b32.xlu1 %v4010_v34, %s3540_s4 }
 0x3ed   : > { %v1123_v0 = vpop.xlane.xlu1 %1122 }
 0x3ee   : > { %3165 = vrcp.f32 %v1123_v0 }
 0x3f1   : > { %v1126_v1 = vpop.xlane.xlu1 %1125 }
 0x3f2   : > { %3167 = vrcp.f32 %v1126_v1 }
 0x3f5   : > { %v1369_v11 = vpop.permute.xlu1 %1368 }
 0x3f8   : > { %v3166_v2 = vpop.eup %3165 }
 0x3f9   : > { %v1129_v4 = vmul.f32 %v3166_v2, %v3162_v60 }
 0x3fb   : > { %v1133_v5 = vadd.f32 %v1131_v3, %v1129_v4  ;;  %2920 = vmatmul.mubr.msk.f32.vlgmr.msra.gmra.mrb[6].mxu1 %vm952_vm2, %v1129_v4 }
 0x3fc   : > { %v3168_v7 = vpop.eup %3167  ;;  %2923 = vmatpush3.msra.mxu1 %v4055_v6  ;;  %2924 = vmatprep.mubr.msk.f32.mxu1 %vm3539_vm1, %v3538_v22 }
 0x3fd   : > { %1135 = vst.msk [vmem:[%s4036_s3] sm:$0xff] %vm952_vm2, %v1133_v5  ;;  %v1130_v9 = vmul.f32 %v3168_v7, %v3164_v62  ;;  %2932 = vmatprep.subr.mxu1 %v3538_v22 }
 0x3ff   : > { %v1134_v10 = vadd.f32 %v1132_v8, %v1130_v9  ;;  %2925 = vmatmul.mubr.msk.f32.vlgmr.msra.gmra.mrb[8].mxu1 %vm952_vm2, %v1130_v9 }
 0x400   : > { %2934 = vmatprep.mubr.msk.f32.mxu1 %vm3539_vm1, %v3538_v22 }
 0x401   : > { %1136 = vst.msk [vmem:[%s4036_s3 + $0x8] sm:$0xff] %vm952_vm2, %v1134_v10 }
 0x403   : > { %2933 = vmatpush3.xpose.msk.msra.mxu1 %vm952_vm2, %v1372_v55 }
 0x404   : > { %2942 = vmatprep.subr.mxu1 %v3538_v22  ;;  %v1469_v42 = vld [vmem:[%s4036_s3] sm:$0xff] }
 0x406   : > { %2935 = vmatmul.mubr.msk.f32.vlgmr.msra.gmra.mrb[10].mxu1 %vm952_vm2, %v1369_v11 }
 0x407   : > { %2944 = vmatprep.mubr.msk.f32.mxu1 %vm3539_vm1, %v3538_v22 }
 0x408   : > { %v1470_v57 = vld [vmem:[%s4036_s3 + $0x8] sm:$0xff] }
 0x42e   : > { %v1364_v12 = vpop.f32.mrb[4].mxu0 }
 0x42f   : > { %v1365_v13 = vadd.f32 %v4024_v41, %v1364_v12  ;;  %v2931_v14 = vpop.f32.mrb[5].mxu0 }
 0x431   : > { %v1447_v15 = vsel %vm952_vm2, %v1365_v13, -inf }
 0x432   : > { %1448 = vmax.xlane.f32.xlu0 %v1447_v15 }
 0x4bf   : > { %v1449_v16 = vpop.xlane.xlu0 %1448 }
 0x4c0   : > { %v1453_v19 = vsub.f32 %v1365_v13, %v1449_v16 }
 0x4c2   : > { %v1455_v20 = vmul.f32 1.442695, %v1453_v19 }
 0x4c4   : > { %3169 = vpow2.f32 %v1455_v20 }
 0x4ce   : > { %v3170_v21 = vpop.eup %3169  ;;  %v1208_v23 = vpop.f32.mrb[6].mxu1 }
 0x4cf   : > { %1285 = vst.msk [vmem:[#allocation4] sm:$0xff] %vm952_vm2, %v1208_v23  ;;  %v2921_v24 = vpop.f32.mrb[7].mxu1  ;;  %v1459_v25 = vsel %vm952_vm2, %v3170_v21, 0.0 }
 0x4d0   : > { %1460 = vadd.xlane.f32.xlu0 %v1459_v25 }
 0x4d2   : > { %v1281_v26 = vpop.f32.mrb[8].mxu1 }
 0x4d3   : > { %1286 = vst.msk [vmem:[#allocation4 + $0x8] sm:$0xff] %vm952_vm2, %v1281_v26  ;;  %v2926_v27 = vpop.f32.mrb[9].mxu1 }
 0x4d9   : > { %v1443_v28 = vpop.f32.mrb[10].mxu1 }
 0x4da   : > { %v1444_v29 = vadd.f32 %v4028_v45, %v1443_v28  ;;  %v2936_v30 = vpop.f32.mrb[11].mxu1 }
 0x4dc   : > { %v1450_v35 = vsel %vm952_vm2, %v1444_v29, -inf }
 0x4dd   : > { %1451 = vmax.xlane.f32.xlu1 %v1450_v35 }
 0x4e6   : > { %1478 = vrot.lane.b32.xlu0 %v4019_v40, %s3540_s4 }
 0x4ee   : > { %1555 = vrot.lane.b32.xlu1 %v4055_v6, %s3540_s4 }
 0x4f2   : > { %1647 = vrot.lane.b32.xlu1 %v3997_v33, %s3541_s11 }
 0x4f6   : > { %1726 = vrot.lane.b32.xlu1 %v3991_v31, %s3541_s11 }
 0x4fa   : > { %1723 = vrot.lane.b32.xlu1 %v4010_v34, %s3541_s11 }
 0x55d   : > { %v1461_v36 = vpop.xlane.xlu0 %1460 }
 0x55e   : > { %3171 = vrcp.f32 %v1461_v36 }
 0x561   : > { %v1479_v37 = vpop.permute.xlu0 %1478 }
 0x562   : > { %2938 = vmatpush3.msra.mxu0 %v1479_v37 }
 0x563   : > { %2947 = vmatprep.subr.mxu0 %v3538_v22 }
 0x568   : > { %v3172_v38 = vpop.eup %3171 }
 0x569   : > { %v1467_v39 = vmul.f32 %v3172_v38, %v3170_v21 }
 0x56a   : > { %v1452_v43 = vpop.xlane.xlu1 %1451 }
 0x56b   : > { %v1471_v44 = vadd.f32 %v1469_v42, %v1467_v39  ;;  %v1454_v46 = vsub.f32 %v1444_v29, %v1452_v43  ;;  %2940 = vmatmul.mubr.msk.f32.vlgmr.msra.gmra.mrb[6].mxu0 %vm952_vm2, %v1467_v39 }
 0x56c   : > { %2949 = vmatprep.mubr.msk.f32.mxu0 %vm3539_vm1, %v3538_v22 }
 0x56d   : > { %1473 = vst.msk [vmem:[%s4036_s3] sm:$0xff] %vm952_vm2, %v1471_v44  ;;  %v1457_v47 = vmul.f32 1.442695, %v1454_v46 }
 0x56e   : > { %v1556_v48 = vpop.permute.xlu1 %1555 }
 0x56f   : > { %3173 = vpow2.f32 %v1457_v47  ;;  %2943 = vmatpush3.msra.mxu1 %v1556_v48 }
 0x570   : > { %2952 = vmatprep.subr.mxu1 %v3538_v22 }
 0x572   : > { %v1648_v49 = vpop.permute.xlu1 %1647 }
 0x573   : > { %2948 = vmatpush3.xpose.msk.msra.mxu0 %vm952_vm2, %v1648_v49 }
 0x574   : > { %2957 = vmatprep.subr.mxu0 %v3538_v22  ;;  %v1824_v24 = vld [vmem:[%s4036_s3] sm:$0xff] }
 0x576   : > { %v1727_v55 = vpop.permute.xlu1 %1726 }
 0x579   : > { %v3174_v50 = vpop.eup %3173 }
 0x57a   : > { %v1462_v51 = vsel %vm952_vm2, %v3174_v50, 0.0  ;;  %v1724_v59 = vpop.permute.xlu1 %1723 }
 0x57b   : > { %1463 = vadd.xlane.f32.xlu0 %v1462_v51 }
 0x591   : > { %1644 = vrot.lane.b32.xlu0 %v3995_v32, %s3541_s11 }
 0x608   : > { %v1464_v52 = vpop.xlane.xlu0 %1463 }
 0x609   : > { %3175 = vrcp.f32 %v1464_v52 }
 0x60c   : > { %v1645_v53 = vpop.permute.xlu0 %1644 }
 0x60d   : > { %2950 = vmatmul.mubr.msk.f32.vlgmr.msra.gmra.mrb[8].mxu0 %vm952_vm2, %v1645_v53 }
 0x60e   : > { %2959 = vmatprep.mubr.msk.f32.mxu0 %vm3539_vm1, %v3538_v22 }
 0x613   : > { %v3176_v54 = vpop.eup %3175 }
 0x614   : > { %v1468_v56 = vmul.f32 %v3176_v54, %v3174_v50 }
 0x616   : > { %v1472_v58 = vadd.f32 %v1470_v57, %v1468_v56  ;;  %2945 = vmatmul.mubr.msk.f32.vlgmr.msra.gmra.mrb[12].mxu1 %vm952_vm2, %v1468_v56 }
 0x617   : > { %2953 = vmatpush3.xpose.msk.msra.mxu1 %vm952_vm2, %v1727_v55  ;;  %2954 = vmatprep.mubr.msk.f32.mxu1 %vm3539_vm1, %v3538_v22 }
 0x618   : > { %1474 = vst.msk [vmem:[%s4036_s3 + $0x8] sm:$0xff] %vm952_vm2, %v1472_v58  ;;  %2962 = vmatprep.subr.mxu1 %v3538_v22 }
 0x61a   : > { %2955 = vmatmul.mubr.msk.f32.vlgmr.msra.gmra.mrb[14].mxu1 %vm952_vm2, %v1724_v59 }
 0x61b   : > { %2964 = vmatprep.mubr.msk.f32.mxu1 %vm3539_vm1, %v3538_v22 }
 0x61f   : > { %v1825_v35 = vld [vmem:[%s4036_s3 + $0x8] sm:$0xff] }
 0x63e   : > { %v4118_v60 = vpop.f32.mrb[6].mxu0 }
 0x63f   : > { %v2941_v61 = vpop.f32.mrb[7].mxu0 }
 0x6e0   : > { %v1719_v62 = vpop.f32.mrb[8].mxu0 }
 0x6e1   : > { %v1720_v63 = vadd.f32 %v4024_v41, %v1719_v62  ;;  %v2951_v0 = vpop.f32.mrb[9].mxu0 }
 0x6e3   : > { %v1802_v1 = vsel %vm952_vm2, %v1720_v63, -inf }
 0x6e4   : > { %1803 = vmax.xlane.f32.xlu0 %v1802_v1 }
 0x6e9   : > { %v4122_v2 = vpop.f32.mrb[12].mxu1 }
 0x6ea   : > { %v2946_v3 = vpop.f32.mrb[13].mxu1 }
 0x6ed   : > { %v1798_v4 = vpop.f32.mrb[14].mxu1 }
 0x6ee   : > { %v1799_v5 = vadd.f32 %v4028_v45, %v1798_v4  ;;  %v2956_v7 = vpop.f32.mrb[15].mxu1 }
 0x6f0   : > { %v1805_v8 = vsel %vm952_vm2, %v1799_v5, -inf }
 0x6f1   : > { %1806 = vmax.xlane.f32.xlu1 %v1805_v8 }
 0x702   : > { %1910 = vrot.lane.b32.xlu1 %v4055_v6, %s3541_s11 }
 0x706   : > { %2002 = vrot.lane.b32.xlu1 %v3997_v33, %s3542_s1 }
 0x70a   : > { %2081 = vrot.lane.b32.xlu1 %v3991_v31, %s3542_s1 }
 0x70e   : > { %2078 = vrot.lane.b32.xlu1 %v4010_v34, %s3542_s1 }
 0x771   : > { %v1804_v9 = vpop.xlane.xlu0 %1803 }
 0x772   : > { %v1808_v10 = vsub.f32 %v1720_v63, %v1804_v9 }
 0x774   : > { %v1810_v11 = vmul.f32 1.442695, %v1808_v10 }
 0x776   : > { %3177 = vpow2.f32 %v1810_v11 }
 0x77e   : > { %v1807_v12 = vpop.xlane.xlu1 %1806 }
 0x77f   : > { %v1809_v31 = vsub.f32 %v1799_v5, %v1807_v12 }
 0x780   : > { %v3178_v13 = vpop.eup %3177 }
 0x781   : > { %v1814_v14 = vsel %vm952_vm2, %v3178_v13, 0.0  ;;  %v1812_v33 = vmul.f32 1.442695, %v1809_v31  ;;  %v2361_v31 = vld [vmem:[%s4423_s14 + $0x8] sm:$0xff] }
 0x782   : > { %1815 = vadd.xlane.f32.xlu0 %v1814_v14  ;;  %v1911_v15 = vpop.permute.xlu1 %1910 }
 0x783   : > { %2963 = vmatpush3.msra.mxu1 %v1911_v15  ;;  %3179 = vpow2.f32 %v1812_v33  ;;  %v2360_v15 = vld [vmem:[%s4423_s14] sm:$0xff] }
 0x784   : > { %2972 = vmatprep.subr.mxu1 %v3538_v22  ;;  %v3022_v33 = vpack.c.bf16 %v2361_v31, %v2360_v15 }
 0x786   : > { %v2003_v25 = vpop.permute.xlu1 %2002 }
 0x78a   : > { %v2082_v29 = vpop.permute.xlu1 %2081 }
 0x78d   : > { %v3180_v34 = vpop.eup %3179 }
 0x78e   : > { %v1817_v16 = vsel %vm952_vm2, %v3180_v34, 0.0  ;;  %v2079_v37 = vpop.permute.xlu1 %2078 }
 0x798   : > { %1833 = vrot.lane.b32.xlu0 %v4019_v40, %s3541_s11  ;;  %s4427_s11 = sld [smem:[#allocation46_spill]] }
 0x7b7   : > { %1818 = vadd.xlane.f32.xlu0 %v1817_v16  ;;  %v2363_v16 = vld [vmem:[%s4423_s14 + $0x18] sm:$0xff] }
 0x7cd   : > { %1999 = vrot.lane.b32.xlu0 %v3995_v32, %s3542_s1 }
 0x80f   : > { %v1816_v19 = vpop.xlane.xlu0 %1815 }
 0x810   : > { %3181 = vrcp.f32 %v1816_v19 }
 0x813   : > { %v1834_v20 = vpop.permute.xlu0 %1833 }
 0x814   : > { %2958 = vmatpush3.msra.mxu0 %v1834_v20 }
 0x815   : > { %2967 = vmatprep.subr.mxu0 %v3538_v22 }
 0x81a   : > { %v3182_v21 = vpop.eup %3181 }
 0x81b   : > { %v1822_v23 = vmul.f32 %v3182_v21, %v3178_v13 }
 0x81d   : > { %v1826_v26 = vadd.f32 %v1824_v24, %v1822_v23  ;;  %2960 = vmatmul.mubr.msk.f32.vlgmr.msra.gmra.mrb[10].mxu0 %vm952_vm2, %v1822_v23 }
 0x81e   : > { %2968 = vmatpush3.xpose.msk.msra.mxu0 %vm952_vm2, %v2003_v25  ;;  %2969 = vmatprep.mubr.msk.f32.mxu0 %vm3539_vm1, %v3538_v22 }
 0x81f   : > { %1828 = vst.msk [vmem:[%s4036_s3] sm:$0xff] %vm952_vm2, %v1826_v26  ;;  %2977 = vmatprep.subr.mxu0 %v3538_v22 }
 0x844   : > { %v1819_v32 = vpop.xlane.xlu0 %1818 }
 0x845   : > { %3183 = vrcp.f32 %v1819_v32 }
 0x848   : > { %v2000_v27 = vpop.permute.xlu0 %1999 }
 0x849   : > { %2970 = vmatmul.mubr.msk.f32.vlgmr.msra.gmra.mrb[12].mxu0 %vm952_vm2, %v2000_v27 }
 0x84a   : > { %2979 = vmatprep.mubr.msk.f32.mxu0 %vm3539_vm1, %v3538_v22 }
 0x84f   : > { %v3184_v28 = vpop.eup %3183 }
 0x850   : > { %v1823_v30 = vmul.f32 %v3184_v28, %v3180_v34  ;;  %v2362_v34 = vld [vmem:[%s4423_s14 + $0x10] sm:$0xff]  ;;  %v2800_v28 = vld [vmem:[%s4424_s12] ss:$0 sm:$0xff] }
 0x851   : > { %v3026_v19 = vpack.c.bf16 %v2363_v16, %v2362_v34 }
 0x852   : > { %v1827_v36 = vadd.f32 %v1825_v35, %v1823_v30  ;;  %2965 = vmatmul.mubr.msk.f32.vlgmr.msra.gmra.mrb[16].mxu1 %vm952_vm2, %v1823_v30 }
 0x853   : > { %2973 = vmatpush3.xpose.msk.msra.mxu1 %vm952_vm2, %v2082_v29  ;;  %2974 = vmatprep.mubr.msk.f32.mxu1 %vm3539_vm1, %v3538_v22 }
 0x854   : > { %1829 = vst.msk [vmem:[%s4036_s3 + $0x8] sm:$0xff] %vm952_vm2, %v1827_v36  ;;  %2982 = vmatprep.subr.mxu1 %v3538_v22 }
 0x856   : > { %2975 = vmatmul.mubr.msk.f32.vlgmr.msra.gmra.mrb[18].mxu1 %vm952_vm2, %v2079_v37 }
 0x857   : > { %2984 = vmatprep.mubr.msk.f32.mxu1 %vm3539_vm1, %v3538_v22 }
 0x85b   : > { %v2180_v11 = vld [vmem:[%s4036_s3 + $0x8] sm:$0xff] }
 0x8f0   : > { %v1905_v38 = vpop.f32.mrb[10].mxu0 }
 0x8f1   : > { %v2961_v39 = vpop.f32.mrb[11].mxu0 }
 0x91c   : > { %v2074_v42 = vpop.f32.mrb[12].mxu0 }
 0x91d   : > { %v2075_v43 = vadd.f32 %v4024_v41, %v2074_v42  ;;  %v2971_v44 = vpop.f32.mrb[13].mxu0 }
 0x91f   : > { %v2157_v46 = vsel %vm952_vm2, %v2075_v43, -inf }
 0x920   : > { %2158 = vmax.xlane.f32.xlu0 %v2157_v46 }
 0x925   : > { %v1982_v47 = vpop.f32.mrb[16].mxu1 }
 0x926   : > { %v2966_v48 = vpop.f32.mrb[17].mxu1 }
 0x929   : > { %v2153_v49 = vpop.f32.mrb[18].mxu1 }
 0x92a   : > { %v2154_v50 = vadd.f32 %v4028_v45, %v2153_v49  ;;  %v2976_v51 = vpop.f32.mrb[19].mxu1 }
 0x92c   : > { %v2160_v52 = vsel %vm952_vm2, %v2154_v50, -inf }
 0x92d   : > { %2161 = vmax.xlane.f32.xlu1 %v2160_v52 }
 0x93e   : > { %2265 = vrot.lane.b32.xlu1 %v4055_v6, %s3542_s1 }
 0x942   : > { %1633 = vrot.lane.b32.xlu1 %v4118_v60, %s3543_s28 }
 0x946   : > { %1635 = vrot.lane.b32.xlu1 %v4122_v2, %s3543_s28  ;;  %v2179_v2 = vld [vmem:[%s4036_s3] sm:$0xff] }
 0x94a   : > { %1990 = vrot.lane.b32.xlu1 %v1982_v47, %s3544_s29 }
 0x9ad   : > { %v2159_v22 = vpop.xlane.xlu0 %2158 }
 0x9ae   : > { %v2163_v41 = vsub.f32 %v2075_v43, %v2159_v22 }
 0x9b0   : > { %v2165_v53 = vmul.f32 1.442695, %v2163_v41 }
 0x9b2   : > { %3185 = vpow2.f32 %v2165_v53 }
 0x9ba   : > { %v2162_v45 = vpop.xlane.xlu1 %2161 }
 0x9bb   : > { %v2164_v54 = vsub.f32 %v2154_v50, %v2162_v45 }
 0x9bc   : > { %v3186_v55 = vpop.eup %3185 }
 0x9bd   : > { %v2167_v56 = vmul.f32 1.442695, %v2164_v54  ;;  %v2169_v57 = vsel %vm952_vm2, %v3186_v55, 0.0 }
 0x9be   : > { %2170 = vadd.xlane.f32.xlu0 %v2169_v57  ;;  %v2266_v6 = vpop.permute.xlu1 %2265 }
 0x9bf   : > { %3187 = vpow2.f32 %v2167_v56  ;;  %2983 = vmatpush3.msra.mxu1 %v2266_v6 }
 0x9c2   : > { %v1634_v58 = vpop.permute.xlu1 %1633 }
 0x9c3   : > { %1640 = vst.msk [vmem:[#allocation4] sm:$0xff] %vm1639_vm3, %v1634_v58 }
 0x9c6   : > { %v1636_v59 = vpop.permute.xlu1 %1635 }
 0x9c7   : > { %1641 = vst.msk [vmem:[#allocation4 + $0x8] sm:$0xff] %vm1639_vm3, %v1636_v59 }
 0x9c9   : > { %v3188_v60 = vpop.eup %3187 }
 0x9ca   : > { %v1991_v61 = vpop.permute.xlu1 %1990  ;;  %v2172_v62 = vsel %vm952_vm2, %v3188_v60, 0.0 }
 0x9cb   : > { %1996 = vst.msk [vmem:[#allocation4 + $0x8] sm:$0xff] %vm1994_vm4, %v1991_v61  ;;  %2173 = vadd.xlane.f32.xlu0 %v2172_v62 }
 0x9e1   : > { %2188 = vrot.lane.b32.xlu0 %v4019_v40, %s3542_s1  ;;  %s4223_s1 = scalar_lea.hbm %s4427_s11, %s2816_s26 }
 0x9e5   : > { %1988 = vrot.lane.b32.xlu0 %v1905_v38, %s3544_s29  ;;  %s2538_s29 = sshll.u32 %s4036_s3, 4  ;;  %s4226_s29 = int_to_ptr.vmem [resolvable:$true] %s2538_s29 }
 0x9e6   : > { %s3399_s10 = scalar_lea.vmem %s4226_s29, 256  ;;  %p3406_p13 = scmp.lt.s32.totalorder %s4226_s29, %s3404_s15 }
 0x9e7   : > { %p3400_p7 = scmp.ne.s32.totalorder %s4226_s29, %s3399_s10  ;;  %p3407_p12 = scmp.lt.s32.totalorder %s3405_s6, %s3399_s10 }
 0x9e9   : > { %p3401_p4 = pnand %p3400_p7, %p4428_p6  ;;  %p3408_p9 = por %p3407_p12, %p3406_p13 }
 0x9eb   : > { %p3402_p1 = pneg %p3401_p4 }
 0x9ed   : > { %p3409_p0 = pnand %p3408_p9, %p3402_p1 }
 0xa4b   : > { %v2171_v63 = vpop.xlane.xlu0 %2170 }
 0xa4c   : > { %3189 = vrcp.f32 %v2171_v63 }
 0xa56   : > { %v3190_v0 = vpop.eup %3189 }
 0xa57   : > { %v2177_v1 = vmul.f32 %v3190_v0, %v3186_v55 }
 0xa58   : > { %v2174_v3 = vpop.xlane.xlu0 %2173 }
 0xa59   : > { %v2181_v4 = vadd.f32 %v2179_v2, %v2177_v1  ;;  %3191 = vrcp.f32 %v2174_v3 }
 0xa5b   : > { %2183 = vst.msk [vmem:[%s4036_s3] sm:$0xff] %vm952_vm2, %v2181_v4 }
 0xa5c   : > { %v2189_v5 = vpop.permute.xlu0 %2188 }
 0xa5d   : > { %2978 = vmatpush3.msra.mxu0 %v2189_v5 }
 0xa5e   : > { %2980 = vmatmul.mubr.msk.f32.vlgmr.msra.gmra.mrb[14].mxu0 %vm952_vm2, %v2177_v1  ;;  %3023 = vmatprep.subr.bf16.mxu0 %v3022_v33 }
 0xa5f   : > { %3025 = vmatpush3.bf16.msra.mxu0 %v3022_v33 }
 0xa60   : > { %v1989_v40 = vpop.permute.xlu0 %1988  ;;  %3027 = vmatprep.subr.bf16.mxu0 %v3026_v19 }
 0xa61   : > { %1995 = vst.msk [vmem:[#allocation4] sm:$0xff] %vm1994_vm4, %v1989_v40 }
 0xa62   : > { %v2352_v7 = vld [vmem:[%s4036_s3] sm:$0xff] }
 0xa63   : > { %v3192_v8 = vpop.eup %3191  ;;  %v2354_v9 = vmul.f32 0.25, %v2352_v7  ;;  %3029 = vmatpush3.bf16.msra.mxu0 %v3026_v19 }
 0xa64   : > { %v2178_v10 = vmul.f32 %v3192_v8, %v3188_v60 }
 0xa65   : > { %2356 = vst.msk [vmem:[%s4036_s3] sm:$0xff] %vm952_vm2, %v2354_v9 }
 0xa66   : > { %v2182_v12 = vadd.f32 %v2180_v11, %v2178_v10  ;;  %2985 = vmatmul.mubr.msk.f32.vlgmr.msra.gmra.mrb[20].mxu1 %vm952_vm2, %v2178_v10 }
 0xa68   : > { %2184 = vst.msk [vmem:[%s4036_s3 + $0x8] sm:$0xff] %vm952_vm2, %v2182_v12 }
 0xa6f   : > { %v2353_v13 = vld [vmem:[%s4036_s3 + $0x8] sm:$0xff] }
 0xa70   : > { %v2355_v14 = vmul.f32 0.25, %v2353_v13 }
 0xa72   : > { %2357 = vst.msk [vmem:[%s4036_s3 + $0x8] sm:$0xff] %vm952_vm2, %v2355_v14 }
 0xb31   : > { %v2260_v20 = vpop.f32.mrb[14].mxu0 }
 0xb32   : > { %2343 = vrot.lane.b32.xlu0 %v2260_v20, %s3545_s13  ;;  %v2981_v21 = vpop.f32.mrb[15].mxu0 }
 0xb39   : > { %v2337_v23 = vpop.f32.mrb[20].mxu1 }
 0xb3a   : > { %2345 = vrot.lane.b32.xlu1 %v2337_v23, %s3545_s13  ;;  %v2986_v24 = vpop.f32.mrb[21].mxu1 }
 0xba4   : > { %v2344_v25 = vpop.permute.xlu0 %2343 }
 0xba5   : > { %2350 = vst.msk [vmem:[#allocation4] sm:$0xff] %vm2349_vm5, %v2344_v25 }
 0xbac   : > { %v2346_v26 = vpop.permute.xlu1 %2345  ;;  %v2358_v32 = vld [vmem:[#allocation4] sm:$0xff] }
 0xbad   : > { %2351 = vst.msk [vmem:[#allocation4 + $0x8] sm:$0xff] %vm2349_vm5, %v2346_v26  ;;  %2995 = vmatprep.mubr.msk.f32.mxu0 %vm671_vm0, %v2358_v32 }
 0xbb4   : > { %v2359_v27 = vld [vmem:[#allocation4 + $0x8] sm:$0xff] }
 0xbb5   : > { %2996 = vmatmul.mubr.msk.f32.vlgmr.msra.gmra.mrb[16].mxu0 %vm671_vm0, %v2359_v27 }
 0xc88   : > { %v2997_v29 = vpop.f32.mrb[16].mxu0 }
 0xc89   : > { %v2449_v30 = vadd.f32 %v2997_v29, %v2800_v28  ;;  %v2443_v35 = vpop.f32.mrb[17].mxu0 }
 0xc8a   : > { %v2444_v36 = vadd.f32 %v2800_v28, %v2443_v35 }
 0xc8b   : > { %v2453_v37 = vadd.f32 %v2449_v30, %v3972_v18 }
 0xc8c   : > { %v2452_v38 = vadd.f32 %v2444_v36, %v3965_v17 }
 0xc8d   : > { %v2457_v39 = vsel %vm671_vm0, %v2453_v37, 0.0 }
 0xc8e   : > { %2458 = vadd.xlane.f32.xlu1 %v2457_v39  ;;  %v2454_v42 = vsel %vm671_vm0, %v2452_v38, 0.0 }
 0xc8f   : > { %2455 = vadd.xlane.f32.xlu0 %v2454_v42 }
 0xd1b   : > { %v2459_v43 = vpop.xlane.xlu1 %2458 }
 0xd1c   : > { %v2462_v44 = vmul.f32 0.03125, %v2459_v43  ;;  %v2456_v46 = vpop.xlane.xlu0 %2455 }
 0xd1d   : > { %v2461_v47 = vmul.f32 0.03125, %v2456_v46 }
 0xd1e   : > { %v2464_v48 = vsub.f32 %v2453_v37, %v2462_v44 }
 0xd1f   : > { %v2463_v49 = vsub.f32 %v2452_v38, %v2461_v47 }
 0xd20   : > { %v2466_v50 = vmul.f32 %v2464_v48, %v2464_v48 }
 0xd21   : > { %v2465_v18 = vmul.f32 %v2463_v49, %v2463_v49 }
 0xd22   : > { %v2470_v51 = vsel %vm671_vm0, %v2466_v50, 0.0 }
 0xd23   : > { %v2467_v17 = vsel %vm671_vm0, %v2465_v18, 0.0 }
 0xd24   : > { %2468 = vadd.xlane.f32.xlu0 %v2467_v17 }
 0xd28   : > { %2471 = vadd.xlane.f32.xlu0 %v2470_v51 }
 0xd29   : > { %3412 = shalt.err (!%p3409_p0)
}
 0xd2a   : > { %s3413_s3 = scalar_lea.hbm %s4223_s1, 256  ;;  %s3417_s25 = scalar_lea.hbm %s4427_s11, 512 }
 0xd2b   : > { %p3414_p8 = scmp.ne.s32.totalorder %s4223_s1, %s3413_s3  ;;  %p3418_p2 = scmp.lt.u32.totalorder %s4223_s1, %s4427_s11 }
 0xd2c   : > { %p3419_p10 = scmp.lt.u32.totalorder %s3417_s25, %s3413_s3  ;;  %p3421_p7 = scmp.lt.u32.totalorder %s3413_s3, %s4223_s1 }
 0xd2d   : > { %p3415_p3 = pnand %p3414_p8, %p4428_p6 }
 0xd2e   : > { %p3420_p5 = por %p3419_p10, %p3418_p2 }
 0xd2f   : > { %p3416_p11 = pneg %p3415_p3 }
 0xd30   : > { %p3422_p4 = por %p3421_p7, %p3420_p5 }
 0xd32   : > { %p3423_p1 = pnand %p3422_p4, %p3416_p11 }
 0xd34   : > { %3426 = shalt.err (!%p3423_p1)
}
 0xd35   : > { %s3547_s27 = smov 128   ;;  %s4429_s4 = sld [smem:[#allocation43_spill]] }
 0xd36   : > { %3053 = dma.vmem_to_hbm [thread:$0]  (%p4428_p6), %s4226_s29, 256, %s4223_s1, %s2507_s22, %s3547_s27, %s3547_s27, %s3543_s28  }
 0xd37   : > { %s4430_s1 = sld [smem:[#allocation44_spill]]  ;;  %s641_s29 = scalar_lea.vmem [#allocation17], %s3945_s23 }
 0xd38   : > { %s2521_s22 = sshll.u32 %s641_s29, 4  ;;  %s4431_s3 = sld [smem:[#allocation45_spill]]  ;;  %s4270_s22 = int_to_ptr.vmem [resolvable:$true] %s2521_s22 }
 0xd39   : > { %s2502_s7 = scalar_lea.sflag [#allocation7], %s3933_s18  ;;  %s3427_s23 = scalar_lea.vmem %s4270_s22, 256 }
 0xd3a   : > { %p3428_p13 = scmp.ne.s32.totalorder %s4270_s22, %s3427_s23  ;;  %s3548_s25 = smov [#allocation17]  }
 0xd3b   : > { %v2803_v56 = vld [vmem:[%s4429_s4] ss:$0 sm:$0xff]  ;;  %s3431_s19 = sshll.u32 %s3548_s25, 4  ;;  %s3432_s19 = int_to_ptr.vmem [resolvable:$false] %s3431_s19 }
 0xd3c   : > { %p3429_p12 = pnand %p3428_p13, %p4428_p6  ;;  %s3433_s13 = scalar_lea.vmem %s3432_s19, 512 }
 0xd3d   : > { %v2804_v6 = vld [vmem:[%s4430_s1] ss:$0 sm:$0xff]  ;;  %p3434_p0 = scmp.lt.s32.totalorder %s4270_s22, %s3432_s19  ;;  %p3435_p8 = scmp.lt.s32.totalorder %s3433_s13, %s3427_s23 }
 0xd3e   : > { %s4268_s24 = scalar_lea.hbm %s4431_s3, %s2816_s26  ;;  %p3430_p9 = pneg %p3429_p12 }
 0xd3f   : > { %p3436_p3 = por %p3435_p8, %p3434_p0 }
 0xd41   : > { %p3437_p11 = pnand %p3436_p3, %p3430_p9 }
 0xdb1   : > { %v2469_v52 = vpop.xlane.xlu0 %2468 }
 0xdb2   : > { %v2473_v22 = vmul.f32 0.03125, %v2469_v52 }
 0xdb4   : > { %v2475_v41 = vadd.f32 1e-05, %v2473_v22 }
 0xdb5   : > { %v2472_v53 = vpop.xlane.xlu0 %2471 }
 0xdb6   : > { %3193 = vrsqrt.f32 %v2475_v41  ;;  %v2474_v45 = vmul.f32 0.03125, %v2472_v53 }
 0xdb8   : > { %v2476_v54 = vadd.f32 1e-05, %v2474_v45 }
 0xdba   : > { %3195 = vrsqrt.f32 %v2476_v54 }
 0xdc0   : > { %v3194_v55 = vpop.eup %3193 }
 0xdc1   : > { %v2479_v57 = vmul.f32 %v3194_v55, %v2463_v49 }
 0xdc3   : > { %v2488_v58 = vmul.f32 %v2803_v56, %v2479_v57 }
 0xdc4   : > { %v3196_v59 = vpop.eup %3195 }
 0xdc5   : > { %v2497_v60 = vadd.f32 %v2804_v6, %v2488_v58  ;;  %v2480_v61 = vmul.f32 %v3196_v59, %v2464_v48 }
 0xdc7   : > { %v2489_v62 = vmul.f32 %v2803_v56, %v2480_v61  ;;  %2499 = vst.msk [vmem:[%s641_s29] sm:$0xff] %vm671_vm0, %v2497_v60 }
 0xdc9   : > { %v2498_v63 = vadd.f32 %v2804_v6, %v2489_v62 }
 0xdcb   : > { %2500 = vst.msk [vmem:[%s641_s29 + $0x8] sm:$0xff] %vm671_vm0, %v2498_v63 }
 0xdcc   : > { %3440 = shalt.err (!%p3437_p11)
}
 0xdcd   : > { %s3441_s26 = scalar_lea.hbm %s4268_s24, 256  ;;  %s3445_s9 = scalar_lea.hbm %s4431_s3, 512 }
 0xdce   : > { %p3442_p2 = scmp.ne.s32.totalorder %s4268_s24, %s3441_s26  ;;  %p3446_p7 = scmp.lt.u32.totalorder %s4268_s24, %s4431_s3 }
 0xdcf   : > { %p3447_p4 = scmp.lt.u32.totalorder %s3445_s9, %s3441_s26  ;;  %p3449_p13 = scmp.lt.u32.totalorder %s3441_s26, %s4268_s24 }
 0xdd0   : > { %p3443_p10 = pnand %p3442_p2, %p4428_p6 }
 0xdd1   : > { %p3448_p1 = por %p3447_p4, %p3446_p7 }
 0xdd2   : > { %p3444_p5 = pneg %p3443_p10 }
 0xdd3   : > { %p3450_p12 = por %p3449_p13, %p3448_p1 }
 0xdd5   : > { %p3451_p9 = pnand %p3450_p12, %p3444_p5 }
 0xdd7   : > { %3454 = shalt.err (!%p3451_p9)
}
 0xdd8   : > { %3052 = dma.vmem_to_hbm [thread:$0]  (%p4428_p6), %s4270_s22, 256, %s4268_s24, %s2502_s7, %s3547_s27, %s3547_s27, %s3543_s28  }
 0xdd9 PF: > { %s4432_s20 = sld [smem:[#allocation26_spill]]  ;;  %s4433_s1 = sld [smem:[#allocation32_spill]] }
 0xdda   : > { %s4434_s29 = sld [smem:[#allocation29_spill]] }
 0xddf   : > { %s2553_s15 = sand.u32 1, %s4432_s20   ;;  %p4435_p0 = scmp.ne.s32.totalorder %s4433_s1, 0 }
 0xde0   : > { %p4436_p8 = scmp.ge.s32.totalorder %s4434_s29, 2  ;;  %s2554_s6 = scalar_lea.sflag [#allocation7], %s2553_s15 }
 0xde2   : > { %p3080_p3 = pnand %p4436_p8, %p4435_p0 }
 0xde4   : > { %3496 = dma.done.wait (!%p3080_p3), %s2554_s6, 256  }
 0xde5   : > { %3498 = vsyncadd (!%p3080_p3), %s2554_s6, 4294967040  ;;  %s2563_s21 = scalar_lea.sflag [#allocation19], %s2553_s15 }
 0xde6   : > { %3500 = dma.done.wait (!%p3080_p3), %s2563_s21, 256  }
 0xde7   : > { %3502 = vsyncadd (!%p3080_p3), %s2563_s21, 4294967040  ;;  %s39_s18 = sadd.s32 1, %s4434_s29   ;;  %s4437_s23 = sld [smem:[#allocation27_spill]] }
 0xde8   : > { %p36_p11 = scmp.ge.s32.totalorder %s39_s18, 4   ;;  %s4438_s15 = sld [smem:[#allocation35_spill]] }
 0xde9   : > { %s4439_s28 = sld [smem:[#allocation33_spill]]  ;;  %s4440_s29 = smov %s3509_s30 }
 0xdea   : > { %s4442_s16 = smov %s3521_s17  ;;  %38 = sbr.rel (!%p36_p11) target bundleno = 24 (0x18), region = 178 }
 0xded   : > { %s4441_s30 = smov %s4437_s23 }
 0xdef   : > { %s4443_s17 = smov %s4439_s28 }
 0xdf1   :  { %2568 = vsyncpa [#allocation6], 1 }
 0xdf2   :  { %2570 = vsyncpa [#allocation6 + $0x1], 1 }
 0xdf3   :  { %2571 = vsyncpa [#allocation9], 1 }
 0xdf4   :  { %2573 = vsyncpa [#allocation9 + $0x1], 1 }
 0xdf5   :  { %2574 = vsyncpa [#allocation12], 1 }
 0xdf6   :  { %2575 = vsyncpa [#allocation15], 1 }
 0xdf7   :  { %2576 = vsyncpa [#allocation7], 1 }
 0xdf8   :  { %2578 = vsyncpa [#allocation7 + $0x1], 1 }
 0xdf9   :  { %2579 = vsyncpa [#allocation19], 1 }
 0xdfa   :  { %2581 = vsyncpa [#allocation19 + $0x1], 1 }

</bundles_post_ra>
